<compile_context>
chip_gen: v7x
topology: tpu7x:2x2x1
jax: 0.10.0
libtpu: 0.0.40
codegen_flags: <defaults>
</compile_context>

<pallas_src>
import functools

import jax
import jax.numpy as jnp
from jax.experimental import pallas as pl
from jax.experimental.pallas import tpu as pltpu

LN_EPS = 1e-5
LANE = 128


def _round_up(x, m):
    return ((x + m - 1) // m) * m


def _pad_axis(x, axis, target):
    pad = target - x.shape[axis]
    if pad <= 0:
        return x
    widths = [(0, 0)] * x.ndim
    widths[axis] = (0, pad)
    return jnp.pad(x, widths)


def _pad2(x, rows, cols):
    return _pad_axis(_pad_axis(x, 0, rows), 1, cols)


# ---------------------------------------------------------------------------
# Kernel
# ---------------------------------------------------------------------------
def decoder_adt_kernel(
    # batch-tiled inputs
    z_ref, eps_ref,
    # VMEM-resident packed weights / biases
    w1z_ref, b1z_ref,                     # fused z-side (n_in, 3*hp + 4*pp), (1, 3*hp + 4*pp)
    bw2_ref, bb2_ref,                     # back  second layer  (hp, hp), (1, hp)
    fw2_ref, fb2_ref,                     # fore  second layer
    sw2_ref, sb2_ref,                     # mix   second layer
    wbt_ref,                              # back-branch h-side heads (hp, 2*pp)
    wg_ref, wm_ref,                       # fore / mix h-side heads  (hp, pp)
    # single lane-dense packed output (tile, 5*pp)
    out_ref,
    *, n_hidden, n_prot, hp, pp, matmul_dtype,
):
    f32 = jnp.float32
    z_mm = z_ref[...]              # already in matmul_dtype (cast host-side)
    eps = eps_ref[...]             # f32, zero-padded beyond n_prot

    # masked LayerNorm (statistics over the real n_hidden features; padded lanes are zero)
    hid_mask = jax.lax.broadcasted_iota(jnp.int32, (1, hp), 1) < n_hidden

    def ln_relu(x):
        mu = jnp.sum(x, axis=-1, keepdims=True) / n_hidden
        d = jnp.where(hid_mask, x - mu, 0.0)
        var = jnp.sum(d * d, axis=-1, keepdims=True) / n_hidden
        return jax.nn.relu(d * jax.lax.rsqrt(var + LN_EPS))   # padded lanes stay exactly 0

    # ---- ONE fused z-side matmul: three MLP first layers + four head z-parts (+ biases) ----
    h1z = jnp.dot(z_mm, w1z_ref[...], preferred_element_type=f32) + b1z_ref[...]
    h_back = ln_relu(h1z[:, 0 * hp:1 * hp])
    h_fore = ln_relu(h1z[:, 1 * hp:2 * hp])
    h_mix = ln_relu(h1z[:, 2 * hp:3 * hp])
    z_heads = h1z[:, 3 * hp:]                    # (tile, 4*pp) : alpha | beta | fscale | mix

    def second_layer(h, w2_ref, b2_ref):
        h2 = jnp.dot(h.astype(matmul_dtype), w2_ref[...],
                     preferred_element_type=f32) + b2_ref[...]
        return ln_relu(h2)

    py_back = second_layer(h_back, bw2_ref, bb2_ref)
    py_fore = second_layer(h_fore, fw2_ref, fb2_ref)
    p_mix = second_layer(h_mix, sw2_ref, sb2_ref)

    # ---- background branch: alpha & beta heads fused on the h-side (N = 2*pp) ----
    bt = jnp.dot(py_back.astype(matmul_dtype), wbt_ref[...], preferred_element_type=f32)
    back_alpha = bt[:, 0 * pp:1 * pp] + z_heads[:, 0 * pp:1 * pp]
    back_beta = jnp.exp(bt[:, 1 * pp:2 * pp] + z_heads[:, 1 * pp:2 * pp])
    log_pro_back_mean = back_alpha + back_beta * eps         # Normal(alpha, beta).rsample()
    rate_back = jnp.exp(log_pro_back_mean)                   # keep in f32 (double exp)

    # ---- foreground branch ----
    fore_scale = jax.nn.relu(
        jnp.dot(py_fore.astype(matmul_dtype), wg_ref[...], preferred_element_type=f32)
        + z_heads[:, 2 * pp:3 * pp]) + 1.0 + 1e-8
    rate_fore = rate_back * fore_scale

    # ---- mixing branch ----
    mixing = (jnp.dot(p_mix.astype(matmul_dtype), wm_ref[...], preferred_element_type=f32)
              + z_heads[:, 3 * pp:4 * pp])
    protein_mixing = jax.nn.sigmoid(mixing)

    # L1 normalize over the real n_prot lanes only (padded lanes masked to 0)
    prot_mask = jax.lax.broadcasted_iota(jnp.int32, (1, pp), 1) < n_prot
    unnorm = jnp.where(prot_mask, (1.0 - protein_mixing) * rate_fore, 0.0)
    l1 = jnp.sum(jnp.abs(unnorm), axis=-1, keepdims=True)
    inv = pl.reciprocal(jnp.maximum(l1, 1e-12), approx=True)   # single EUP vrcp
    scale = unnorm * inv

    # ---- 5-slab lane-dense output (derived outputs recomputed in the wrapper) ----
    out_ref[:, 0 * pp:1 * pp] = back_alpha
    out_ref[:, 1 * pp:2 * pp] = back_beta
    out_ref[:, 2 * pp:3 * pp] = fore_scale
    out_ref[:, 3 * pp:4 * pp] = mixing
    out_ref[:, 4 * pp:5 * pp] = scale


# ---------------------------------------------------------------------------
# Wrapper: weight packing / lane padding / batch grid / output unpacking
# ---------------------------------------------------------------------------
def pack_params(p, n_hidden, n_prot, matmul_dtype):
    hp = _round_up(n_hidden, LANE)
    pp = _round_up(n_prot, LANE)
    wdt = matmul_dtype
    packed = {}
    # fused z-side RHS: [w1_back | w1_fore | w1_mix | wz_alpha | wz_beta | wz_fscale | wz_mix]
    packed["w1z"] = jnp.concatenate(
        [_pad_axis(p["b_w1"], 1, hp), _pad_axis(p["f_w1"], 1, hp), _pad_axis(p["s_w1"], 1, hp),
         _pad_axis(p["a_wz"], 1, pp), _pad_axis(p["t_wz"], 1, pp),
         _pad_axis(p["g_wz"], 1, pp), _pad_axis(p["m_wz"], 1, pp)], axis=1).astype(wdt)
    packed["b1z"] = jnp.concatenate(
        [_pad_axis(p["b_b1"], 1, hp), _pad_axis(p["f_b1"], 1, hp), _pad_axis(p["s_b1"], 1, hp),
         _pad_axis(p["a_b"], 1, pp), _pad_axis(p["t_b"], 1, pp),
         _pad_axis(p["g_b"], 1, pp), _pad_axis(p["m_b"], 1, pp)], axis=1).astype(jnp.float32)
    # second layers
    for src, dst in (("b", "back"), ("f", "fore"), ("s", "mix")):
        packed[f"{dst}_w2"] = _pad2(p[f"{src}_w2"], hp, hp).astype(wdt)
        packed[f"{dst}_b2"] = _pad_axis(p[f"{src}_b2"], 1, hp).astype(jnp.float32)
    # fused h-side of the two back-branch heads; fore/mix h-side heads
    packed["wh_bt"] = jnp.concatenate(
        [_pad2(p["a_wh"], hp, pp), _pad2(p["t_wh"], hp, pp)], axis=1).astype(wdt)
    packed["wh_g"] = _pad2(p["g_wh"], hp, pp).astype(wdt)
    packed["wh_m"] = _pad2(p["m_wh"], hp, pp).astype(wdt)
    return packed, hp, pp


def decoder_adt_forward(z, eps, params, *, tile_b=1024, matmul_dtype=jnp.bfloat16):
    """Whole DecoderADT forward in one batch-tiled Pallas call."""
    assert tile_b % 8 == 0 and tile_b >= 8
    b, n_in = z.shape
    n_prot = params["a_b"].shape[-1]
    n_hidden = params["b_w2"].shape[0]

    packed, hp, pp = pack_params(params, n_hidden, n_prot, matmul_dtype)

    # batch tiling: big tiles (amortize ~0.35us/step), but always >=2 grid steps when the
    # batch allows so the "parallel" axis can shard across v7x's two TensorCores.
    b_pad_min = _round_up(b, 8)
    tile = min(tile_b, b_pad_min)
    if b_pad_min > 8 and b_pad_min // tile < 2:
        tile = max(8, _round_up(b_pad_min // 2, 8))
    b_pad = _round_up(b, tile)
    grid = (b_pad // tile,)

    z_p = _pad_axis(z, 0, b_pad).astype(matmul_dtype)    # z only feeds the MXU: cast host-side
    eps_p = _pad2(eps.astype(jnp.float32), b_pad, pp)    # noise stays f32

    weight_keys = ("w1z", "b1z", "back_w2", "back_b2", "fore_w2", "fore_b2",
                   "mix_w2", "mix_b2", "wh_bt", "wh_g", "wh_m")
    w_args = tuple(packed[k] for k in weight_keys)

    def resident(arr):     # weights: same block every grid step -> stay in VMEM, no re-DMA
        return pl.BlockSpec(arr.shape, lambda i: (0, 0))

    in_specs = [
        pl.BlockSpec((tile, n_in), lambda i: (i, 0)),      # z (matmul dtype)
        pl.BlockSpec((tile, pp), lambda i: (i, 0)),        # eps (f32)
    ] + [resident(w) for w in w_args]
    out_specs = pl.BlockSpec((tile, 5 * pp), lambda i: (i, 0))
    out_shape = jax.ShapeDtypeStruct((b_pad, 5 * pp), jnp.float32)

    # advisory cost estimate (matmul-dominated)
    mm_flops = 2 * b_pad * (n_in * (3 * hp + 4 * pp) + 3 * hp * hp
                            + hp * 2 * pp + 2 * hp * pp)
    elementwise_flops = b_pad * (3 * hp + 6 * pp) * 12
    transcendentals = b_pad * (3 * pp + 8)     # exp(beta), exp(rate), sigmoid, rsqrt, recip
    bytes_accessed = int(sum(a.size * a.dtype.itemsize for a in (z_p, eps_p) + w_args)
                         + b_pad * 5 * pp * 4)

    kernel = functools.partial(
        decoder_adt_kernel,
        n_hidden=n_hidden, n_prot=n_prot, hp=hp, pp=pp, matmul_dtype=matmul_dtype)

    fn = pl.pallas_call(
        kernel,
        grid=grid,
        in_specs=in_specs,
        out_specs=out_specs,
        out_shape=out_shape,
        compiler_params=pltpu.CompilerParams(
            dimension_semantics=("parallel",),          # megacore / v7x 2-TC sharding
            vmem_limit_bytes=32 * 1024 * 1024),         # tile=1024 footprint ~7 MiB, safe on
                                                        # v5e/v6e (128 MiB) and v7x (64 MiB)
        cost_estimate=pl.CostEstimate(
            flops=int(mm_flops + elementwise_flops),
            transcendentals=int(transcendentals),
            bytes_accessed=bytes_accessed),
    )
    packed_out = fn(z_p, eps_p, *w_args)[:b]

    names = ("back_alpha", "back_beta", "fore_scale", "mixing", "scale")
    out = {name: packed_out[:, k * pp:k * pp + n_prot] for k, name in enumerate(names)}

    # Derived outputs recomputed on the real (B, n_prot) slices: a handful of elementwise
    # ops, removing 3/8 of the kernel's HBM writeback (the kernel is writeback-bound).
    eps32 = eps.astype(jnp.float32)
    out["log_pro_back_mean"] = out["back_alpha"] + out["back_beta"] * eps32
    out["rate_back"] = jnp.exp(out["log_pro_back_mean"])
    out["rate_fore"] = out["rate_back"] * out["fore_scale"]
    return out


# ---------------------------------------------------------------------------
# Plain-JAX reference (same math, same matmul dtype) used only to check the kernel
# ---------------------------------------------------------------------------
def reference_forward(z, eps, params, matmul_dtype=jnp.bfloat16):
    def mm(x, w):
        return jnp.dot(x.astype(matmul_dtype), w.astype(matmul_dtype),
                       preferred_element_type=jnp.float32)

    def layernorm(x):
        mu = jnp.mean(x, axis=-1, keepdims=True)
        var = jnp.mean((x - mu) ** 2, axis=-1, keepdims=True)
        return (x - mu) * jax.lax.rsqrt(var + LN_EPS)

    def mlp2(x, w1, b1, w2, b2):
        h = jax.nn.relu(layernorm(mm(x, w1) + b1))
        return jax.nn.relu(layernorm(mm(h, w2) + b2))

    def head(h, z_, wh, wz, b_):
        return mm(h, wh) + (mm(z_, wz) + b_)

    py_back = mlp2(z, params["b_w1"], params["b_b1"], params["b_w2"], params["b_b2"])
    back_alpha = head(py_back, z, params["a_wh"], params["a_wz"], params["a_b"])
    back_beta = jnp.exp(head(py_back, z, params["t_wh"], params["t_wz"], params["t_b"]))
    log_back = back_alpha + back_beta * eps
    rate_back = jnp.exp(log_back)
    py_fore = mlp2(z, params["f_w1"], params["f_b1"], params["f_w2"], params["f_b2"])
    fore_scale = jax.nn.relu(
        head(py_fore, z, params["g_wh"], params["g_wz"], params["g_b"])) + 1.0 + 1e-8
    rate_fore = rate_back * fore_scale
    p_mix = mlp2(z, params["s_w1"], params["s_b1"], params["s_w2"], params["s_b2"])
    mixing = head(p_mix, z, params["m_wh"], params["m_wz"], params["m_b"])
    pm = jax.nn.sigmoid(mixing)
    unnorm = (1.0 - pm) * rate_fore
    scale = unnorm / jnp.maximum(jnp.sum(jnp.abs(unnorm), -1, keepdims=True), 1e-12)
    return dict(back_alpha=back_alpha, back_beta=back_beta, log_pro_back_mean=log_back,
                rate_back=rate_back, fore_scale=fore_scale, rate_fore=rate_fore,
                mixing=mixing, scale=scale)


def init_params(key, n_input, n_hidden, n_output_proteins):
    """Deterministic synthetic init (PyTorch-Linear-like uniform fan-in bounds)."""
    def linear(k, fan_in, fan_out):
        kw, kb = jax.random.split(k)
        bound = 1.0 / jnp.sqrt(float(fan_in))
        w = jax.random.uniform(kw, (fan_in, fan_out), jnp.float32, -bound, bound)
        b = jax.random.uniform(kb, (1, fan_out), jnp.float32, -bound, bound)
        return w, b

    keys = jax.random.split(key, 10)
    p = {}
    # three 2-layer MLPs: n_input -> n_hidden -> n_hidden
    p["b_w1"], p["b_b1"] = linear(keys[0], n_input, n_hidden)
    p["b_w2"], p["b_b2"] = linear(keys[1], n_hidden, n_hidden)
    p["f_w1"], p["f_b1"] = linear(keys[2], n_input, n_hidden)
    p["f_w2"], p["f_b2"] = linear(keys[3], n_hidden, n_hidden)
    p["s_w1"], p["s_b1"] = linear(keys[4], n_input, n_hidden)
    p["s_w2"], p["s_b2"] = linear(keys[5], n_hidden, n_hidden)
    # four heads: Linear(n_hidden + n_input -> n_output_proteins), weight split h/z
    for name, k in zip(("a", "t", "g", "m"), keys[6:10]):
        w, b = linear(k, n_hidden + n_input, n_output_proteins)
        p[f"{name}_wh"] = w[:n_hidden]
        p[f"{name}_wz"] = w[n_hidden:]
        p[f"{name}_b"] = b
    return p


if __name__ == "__main__":
    B, N_INPUT, N_HIDDEN, N_PROT = 16, 32, 64, 40

    key = jax.random.PRNGKey(0)
    k_z, k_eps, k_params = jax.random.split(key, 3)
    z = jax.random.normal(k_z, (B, N_INPUT), jnp.float32)
    eps = jax.random.normal(k_eps, (B, N_PROT), jnp.float32)   # Normal.rsample noise
    params = init_params(k_params, N_INPUT, N_HIDDEN, N_PROT)

    # Default tile_b=1024 min-clamps to the batch; the >=2-step rule still exercises a
    # multi-step (2-step) batch grid at this toy size.
    out = decoder_adt_forward(z, eps, params, matmul_dtype=jnp.bfloat16)
    jax.block_until_ready(out)

    # Reference uses the same bf16-input / f32-accumulate matmuls so the check is tight;
    # use matmul_dtype=jnp.float32 in both for exact parity with the f32 PyTorch module.
    ref = reference_forward(z, eps, params, matmul_dtype=jnp.bfloat16)
    for name in ref:
        assert out[name].shape == (B, N_PROT), name
        assert jnp.allclose(out[name], ref[name], rtol=1e-3, atol=1e-3), name

    print("KERNEL_OK")
</pallas_src>

<mosaic_0001>
module attributes {stable_mosaic.version = 11 : i64} {
  func.func @decoder_adt_kernel(%arg0: i32, %arg1: memref<8x32xbf16, #tpu.memory_space<vmem>>, %arg2: memref<8x128xf32, #tpu.memory_space<vmem>>, %arg3: memref<32x896xbf16, #tpu.memory_space<vmem>>, %arg4: memref<1x896xf32, #tpu.memory_space<vmem>>, %arg5: memref<128x128xbf16, #tpu.memory_space<vmem>>, %arg6: memref<1x128xf32, #tpu.memory_space<vmem>>, %arg7: memref<128x128xbf16, #tpu.memory_space<vmem>>, %arg8: memref<1x128xf32, #tpu.memory_space<vmem>>, %arg9: memref<128x128xbf16, #tpu.memory_space<vmem>>, %arg10: memref<1x128xf32, #tpu.memory_space<vmem>>, %arg11: memref<128x256xbf16, #tpu.memory_space<vmem>>, %arg12: memref<128x128xbf16, #tpu.memory_space<vmem>>, %arg13: memref<128x128xbf16, #tpu.memory_space<vmem>>, %arg14: memref<8x640xf32, #tpu.memory_space<vmem>>) attributes {dimension_semantics = [#tpu.dimension_semantics<parallel>], iteration_bounds = array<i64: 2>, scalar_prefetch = 0 : i64, scratch_operands = 0 : i64, tpu.core_type = #tpu.core_type<tc>, window_params = [{transform_indices = @transform_0, window_bounds = array<i64: 8, 32>}, {transform_indices = @transform_1, window_bounds = array<i64: 8, 128>}, {pipeline_mode = #tpu.pipeline_mode<synchronous>, transform_indices = @transform_2, window_bounds = array<i64: 32, 896>}, {pipeline_mode = #tpu.pipeline_mode<synchronous>, transform_indices = @transform_3, window_bounds = array<i64: 1, 896>}, {pipeline_mode = #tpu.pipeline_mode<synchronous>, transform_indices = @transform_4, window_bounds = array<i64: 128, 128>}, {pipeline_mode = #tpu.pipeline_mode<synchronous>, transform_indices = @transform_5, window_bounds = array<i64: 1, 128>}, {pipeline_mode = #tpu.pipeline_mode<synchronous>, transform_indices = @transform_6, window_bounds = array<i64: 128, 128>}, {pipeline_mode = #tpu.pipeline_mode<synchronous>, transform_indices = @transform_7, window_bounds = array<i64: 1, 128>}, {pipeline_mode = #tpu.pipeline_mode<synchronous>, transform_indices = @transform_8, window_bounds = array<i64: 128, 128>}, {pipeline_mode = #tpu.pipeline_mode<synchronous>, transform_indices = @transform_9, window_bounds = array<i64: 1, 128>}, {pipeline_mode = #tpu.pipeline_mode<synchronous>, transform_indices = @transform_10, window_bounds = array<i64: 128, 256>}, {pipeline_mode = #tpu.pipeline_mode<synchronous>, transform_indices = @transform_11, window_bounds = array<i64: 128, 128>}, {pipeline_mode = #tpu.pipeline_mode<synchronous>, transform_indices = @transform_12, window_bounds = array<i64: 128, 128>}, {transform_indices = @transform_13, window_bounds = array<i64: 8, 640>}]} {
    %c0 = arith.constant 0 : index
    %c0_0 = arith.constant 0 : index
    %0 = vector.load %arg1[%c0, %c0_0] : memref<8x32xbf16, #tpu.memory_space<vmem>>, vector<8x32xbf16>
    %c0_1 = arith.constant 0 : index
    %c0_2 = arith.constant 0 : index
    %1 = vector.load %arg2[%c0_1, %c0_2] : memref<8x128xf32, #tpu.memory_space<vmem>>, vector<8x128xf32>
    %2 = tpu.iota {dimensions = array<i32: 1>} : vector<1x128xi32>
    %c64_i32 = arith.constant 64 : i32
    %3 = vector.broadcast %c64_i32 : i32 to vector<1x128xi32>
    %4 = arith.cmpi slt, %2, %3 : vector<1x128xi32>
    %c0_3 = arith.constant 0 : index
    %c0_4 = arith.constant 0 : index
    %5 = vector.load %arg3[%c0_3, %c0_4] : memref<32x896xbf16, #tpu.memory_space<vmem>>, vector<32x896xbf16>
    %cst = arith.constant dense<0.000000e+00> : vector<8x896xf32>
    %6 = tpu.matmul %0, %5, %cst {dimension_numbers = #tpu.dot_dimension_numbers<[1], [0], [0], [1], [0, 0, 1, 1], [], []>} : vector<8x32xbf16>, vector<32x896xbf16>, vector<8x896xf32> -> vector<8x896xf32>
    %c0_5 = arith.constant 0 : index
    %c0_6 = arith.constant 0 : index
    %7 = vector.load %arg4[%c0_5, %c0_6] : memref<1x896xf32, #tpu.memory_space<vmem>>, vector<1x896xf32>
    %8 = vector.broadcast %7 : vector<1x896xf32> to vector<8x896xf32>
    %9 = arith.addf %6, %8 : vector<8x896xf32>
    %10 = vector.extract_strided_slice %9 {offsets = [0, 0], sizes = [8, 128], strides = [1, 1]} : vector<8x896xf32> to vector<8x128xf32>
    %cst_7 = arith.constant dense<0.000000e+00> : vector<8xf32>
    %11 = vector.multi_reduction <add>, %10, %cst_7 [1] : vector<8x128xf32> to vector<8xf32>
    %12 = vector.shape_cast %11 : vector<8xf32> to vector<8x1xf32>
    %cst_8 = arith.constant 6.400000e+01 : f32
    %13 = vector.broadcast %cst_8 : f32 to vector<8x1xf32>
    %14 = arith.divf %12, %13 : vector<8x1xf32>
    %15 = vector.broadcast %14 : vector<8x1xf32> to vector<8x128xf32>
    %16 = arith.subf %10, %15 : vector<8x128xf32>
    %cst_9 = arith.constant 0.000000e+00 : f32
    %17 = vector.shape_cast %4 : vector<1x128xi1> to vector<1x128xi1>
    %18 = vector.broadcast %17 : vector<1x128xi1> to vector<8x128xi1>
    %19 = vector.broadcast %cst_9 : f32 to vector<8x128xf32>
    %20 = arith.select %18, %16, %19 : vector<8x128xi1>, vector<8x128xf32>
    %21 = arith.mulf %20, %20 : vector<8x128xf32>
    %cst_10 = arith.constant dense<0.000000e+00> : vector<8xf32>
    %22 = vector.multi_reduction <add>, %21, %cst_10 [1] : vector<8x128xf32> to vector<8xf32>
    %23 = vector.shape_cast %22 : vector<8xf32> to vector<8x1xf32>
    %cst_11 = arith.constant 6.400000e+01 : f32
    %24 = vector.broadcast %cst_11 : f32 to vector<8x1xf32>
    %25 = arith.divf %23, %24 : vector<8x1xf32>
    %cst_12 = arith.constant 9.99999974E-6 : f32
    %26 = vector.broadcast %cst_12 : f32 to vector<8x1xf32>
    %27 = arith.addf %25, %26 : vector<8x1xf32>
    %28 = math.rsqrt %27 : vector<8x1xf32>
    %29 = vector.broadcast %28 : vector<8x1xf32> to vector<8x128xf32>
    %30 = arith.mulf %20, %29 : vector<8x128xf32>
    %cst_13 = arith.constant 0.000000e+00 : f32
    %31 = vector.broadcast %cst_13 : f32 to vector<8x128xf32>
    %32 = arith.maximumf %30, %31 : vector<8x128xf32>
    %33 = vector.extract_strided_slice %9 {offsets = [0, 128], sizes = [8, 128], strides = [1, 1]} : vector<8x896xf32> to vector<8x128xf32>
    %cst_14 = arith.constant dense<0.000000e+00> : vector<8xf32>
    %34 = vector.multi_reduction <add>, %33, %cst_14 [1] : vector<8x128xf32> to vector<8xf32>
    %35 = vector.shape_cast %34 : vector<8xf32> to vector<8x1xf32>
    %cst_15 = arith.constant 6.400000e+01 : f32
    %36 = vector.broadcast %cst_15 : f32 to vector<8x1xf32>
    %37 = arith.divf %35, %36 : vector<8x1xf32>
    %38 = vector.broadcast %37 : vector<8x1xf32> to vector<8x128xf32>
    %39 = arith.subf %33, %38 : vector<8x128xf32>
    %cst_16 = arith.constant 0.000000e+00 : f32
    %40 = vector.shape_cast %4 : vector<1x128xi1> to vector<1x128xi1>
    %41 = vector.broadcast %40 : vector<1x128xi1> to vector<8x128xi1>
    %42 = vector.broadcast %cst_16 : f32 to vector<8x128xf32>
    %43 = arith.select %41, %39, %42 : vector<8x128xi1>, vector<8x128xf32>
    %44 = arith.mulf %43, %43 : vector<8x128xf32>
    %cst_17 = arith.constant dense<0.000000e+00> : vector<8xf32>
    %45 = vector.multi_reduction <add>, %44, %cst_17 [1] : vector<8x128xf32> to vector<8xf32>
    %46 = vector.shape_cast %45 : vector<8xf32> to vector<8x1xf32>
    %cst_18 = arith.constant 6.400000e+01 : f32
    %47 = vector.broadcast %cst_18 : f32 to vector<8x1xf32>
    %48 = arith.divf %46, %47 : vector<8x1xf32>
    %cst_19 = arith.constant 9.99999974E-6 : f32
    %49 = vector.broadcast %cst_19 : f32 to vector<8x1xf32>
    %50 = arith.addf %48, %49 : vector<8x1xf32>
    %51 = math.rsqrt %50 : vector<8x1xf32>
    %52 = vector.broadcast %51 : vector<8x1xf32> to vector<8x128xf32>
    %53 = arith.mulf %43, %52 : vector<8x128xf32>
    %cst_20 = arith.constant 0.000000e+00 : f32
    %54 = vector.broadcast %cst_20 : f32 to vector<8x128xf32>
    %55 = arith.maximumf %53, %54 : vector<8x128xf32>
    %56 = vector.extract_strided_slice %9 {offsets = [0, 256], sizes = [8, 128], strides = [1, 1]} : vector<8x896xf32> to vector<8x128xf32>
    %cst_21 = arith.constant dense<0.000000e+00> : vector<8xf32>
    %57 = vector.multi_reduction <add>, %56, %cst_21 [1] : vector<8x128xf32> to vector<8xf32>
    %58 = vector.shape_cast %57 : vector<8xf32> to vector<8x1xf32>
    %cst_22 = arith.constant 6.400000e+01 : f32
    %59 = vector.broadcast %cst_22 : f32 to vector<8x1xf32>
    %60 = arith.divf %58, %59 : vector<8x1xf32>
    %61 = vector.broadcast %60 : vector<8x1xf32> to vector<8x128xf32>
    %62 = arith.subf %56, %61 : vector<8x128xf32>
    %cst_23 = arith.constant 0.000000e+00 : f32
    %63 = vector.shape_cast %4 : vector<1x128xi1> to vector<1x128xi1>
    %64 = vector.broadcast %63 : vector<1x128xi1> to vector<8x128xi1>
    %65 = vector.broadcast %cst_23 : f32 to vector<8x128xf32>
    %66 = arith.select %64, %62, %65 : vector<8x128xi1>, vector<8x128xf32>
    %67 = arith.mulf %66, %66 : vector<8x128xf32>
    %cst_24 = arith.constant dense<0.000000e+00> : vector<8xf32>
    %68 = vector.multi_reduction <add>, %67, %cst_24 [1] : vector<8x128xf32> to vector<8xf32>
    %69 = vector.shape_cast %68 : vector<8xf32> to vector<8x1xf32>
    %cst_25 = arith.constant 6.400000e+01 : f32
    %70 = vector.broadcast %cst_25 : f32 to vector<8x1xf32>
    %71 = arith.divf %69, %70 : vector<8x1xf32>
    %cst_26 = arith.constant 9.99999974E-6 : f32
    %72 = vector.broadcast %cst_26 : f32 to vector<8x1xf32>
    %73 = arith.addf %71, %72 : vector<8x1xf32>
    %74 = math.rsqrt %73 : vector<8x1xf32>
    %75 = vector.broadcast %74 : vector<8x1xf32> to vector<8x128xf32>
    %76 = arith.mulf %66, %75 : vector<8x128xf32>
    %cst_27 = arith.constant 0.000000e+00 : f32
    %77 = vector.broadcast %cst_27 : f32 to vector<8x128xf32>
    %78 = arith.maximumf %76, %77 : vector<8x128xf32>
    %79 = vector.extract_strided_slice %9 {offsets = [0, 384], sizes = [8, 512], strides = [1, 1]} : vector<8x896xf32> to vector<8x512xf32>
    %80 = arith.truncf %32 : vector<8x128xf32> to vector<8x128xbf16>
    %c0_28 = arith.constant 0 : index
    %c0_29 = arith.constant 0 : index
    %81 = vector.load %arg5[%c0_28, %c0_29] : memref<128x128xbf16, #tpu.memory_space<vmem>>, vector<128x128xbf16>
    %cst_30 = arith.constant dense<0.000000e+00> : vector<8x128xf32>
    %82 = tpu.matmul %80, %81, %cst_30 {dimension_numbers = #tpu.dot_dimension_numbers<[1], [0], [0], [1], [0, 0, 1, 1], [], []>} : vector<8x128xbf16>, vector<128x128xbf16>, vector<8x128xf32> -> vector<8x128xf32>
    %c0_31 = arith.constant 0 : index
    %c0_32 = arith.constant 0 : index
    %83 = vector.load %arg6[%c0_31, %c0_32] : memref<1x128xf32, #tpu.memory_space<vmem>>, vector<1x128xf32>
    %84 = vector.broadcast %83 : vector<1x128xf32> to vector<8x128xf32>
    %85 = arith.addf %82, %84 : vector<8x128xf32>
    %cst_33 = arith.constant dense<0.000000e+00> : vector<8xf32>
    %86 = vector.multi_reduction <add>, %85, %cst_33 [1] : vector<8x128xf32> to vector<8xf32>
    %87 = vector.shape_cast %86 : vector<8xf32> to vector<8x1xf32>
    %cst_34 = arith.constant 6.400000e+01 : f32
    %88 = vector.broadcast %cst_34 : f32 to vector<8x1xf32>
    %89 = arith.divf %87, %88 : vector<8x1xf32>
    %90 = vector.broadcast %89 : vector<8x1xf32> to vector<8x128xf32>
    %91 = arith.subf %85, %90 : vector<8x128xf32>
    %cst_35 = arith.constant 0.000000e+00 : f32
    %92 = vector.shape_cast %4 : vector<1x128xi1> to vector<1x128xi1>
    %93 = vector.broadcast %92 : vector<1x128xi1> to vector<8x128xi1>
    %94 = vector.broadcast %cst_35 : f32 to vector<8x128xf32>
    %95 = arith.select %93, %91, %94 : vector<8x128xi1>, vector<8x128xf32>
    %96 = arith.mulf %95, %95 : vector<8x128xf32>
    %cst_36 = arith.constant dense<0.000000e+00> : vector<8xf32>
    %97 = vector.multi_reduction <add>, %96, %cst_36 [1] : vector<8x128xf32> to vector<8xf32>
    %98 = vector.shape_cast %97 : vector<8xf32> to vector<8x1xf32>
    %cst_37 = arith.constant 6.400000e+01 : f32
    %99 = vector.broadcast %cst_37 : f32 to vector<8x1xf32>
    %100 = arith.divf %98, %99 : vector<8x1xf32>
    %cst_38 = arith.constant 9.99999974E-6 : f32
    %101 = vector.broadcast %cst_38 : f32 to vector<8x1xf32>
    %102 = arith.addf %100, %101 : vector<8x1xf32>
    %103 = math.rsqrt %102 : vector<8x1xf32>
    %104 = vector.broadcast %103 : vector<8x1xf32> to vector<8x128xf32>
    %105 = arith.mulf %95, %104 : vector<8x128xf32>
    %cst_39 = arith.constant 0.000000e+00 : f32
    %106 = vector.broadcast %cst_39 : f32 to vector<8x128xf32>
    %107 = arith.maximumf %105, %106 : vector<8x128xf32>
    %108 = arith.truncf %55 : vector<8x128xf32> to vector<8x128xbf16>
    %c0_40 = arith.constant 0 : index
    %c0_41 = arith.constant 0 : index
    %109 = vector.load %arg7[%c0_40, %c0_41] : memref<128x128xbf16, #tpu.memory_space<vmem>>, vector<128x128xbf16>
    %cst_42 = arith.constant dense<0.000000e+00> : vector<8x128xf32>
    %110 = tpu.matmul %108, %109, %cst_42 {dimension_numbers = #tpu.dot_dimension_numbers<[1], [0], [0], [1], [0, 0, 1, 1], [], []>} : vector<8x128xbf16>, vector<128x128xbf16>, vector<8x128xf32> -> vector<8x128xf32>
    %c0_43 = arith.constant 0 : index
    %c0_44 = arith.constant 0 : index
    %111 = vector.load %arg8[%c0_43, %c0_44] : memref<1x128xf32, #tpu.memory_space<vmem>>, vector<1x128xf32>
    %112 = vector.broadcast %111 : vector<1x128xf32> to vector<8x128xf32>
    %113 = arith.addf %110, %112 : vector<8x128xf32>
    %cst_45 = arith.constant dense<0.000000e+00> : vector<8xf32>
    %114 = vector.multi_reduction <add>, %113, %cst_45 [1] : vector<8x128xf32> to vector<8xf32>
    %115 = vector.shape_cast %114 : vector<8xf32> to vector<8x1xf32>
    %cst_46 = arith.constant 6.400000e+01 : f32
    %116 = vector.broadcast %cst_46 : f32 to vector<8x1xf32>
    %117 = arith.divf %115, %116 : vector<8x1xf32>
    %118 = vector.broadcast %117 : vector<8x1xf32> to vector<8x128xf32>
    %119 = arith.subf %113, %118 : vector<8x128xf32>
    %cst_47 = arith.constant 0.000000e+00 : f32
    %120 = vector.shape_cast %4 : vector<1x128xi1> to vector<1x128xi1>
    %121 = vector.broadcast %120 : vector<1x128xi1> to vector<8x128xi1>
    %122 = vector.broadcast %cst_47 : f32 to vector<8x128xf32>
    %123 = arith.select %121, %119, %122 : vector<8x128xi1>, vector<8x128xf32>
    %124 = arith.mulf %123, %123 : vector<8x128xf32>
    %cst_48 = arith.constant dense<0.000000e+00> : vector<8xf32>
    %125 = vector.multi_reduction <add>, %124, %cst_48 [1] : vector<8x128xf32> to vector<8xf32>
    %126 = vector.shape_cast %125 : vector<8xf32> to vector<8x1xf32>
    %cst_49 = arith.constant 6.400000e+01 : f32
    %127 = vector.broadcast %cst_49 : f32 to vector<8x1xf32>
    %128 = arith.divf %126, %127 : vector<8x1xf32>
    %cst_50 = arith.constant 9.99999974E-6 : f32
    %129 = vector.broadcast %cst_50 : f32 to vector<8x1xf32>
    %130 = arith.addf %128, %129 : vector<8x1xf32>
    %131 = math.rsqrt %130 : vector<8x1xf32>
    %132 = vector.broadcast %131 : vector<8x1xf32> to vector<8x128xf32>
    %133 = arith.mulf %123, %132 : vector<8x128xf32>
    %cst_51 = arith.constant 0.000000e+00 : f32
    %134 = vector.broadcast %cst_51 : f32 to vector<8x128xf32>
    %135 = arith.maximumf %133, %134 : vector<8x128xf32>
    %136 = arith.truncf %78 : vector<8x128xf32> to vector<8x128xbf16>
    %c0_52 = arith.constant 0 : index
    %c0_53 = arith.constant 0 : index
    %137 = vector.load %arg9[%c0_52, %c0_53] : memref<128x128xbf16, #tpu.memory_space<vmem>>, vector<128x128xbf16>
    %cst_54 = arith.constant dense<0.000000e+00> : vector<8x128xf32>
    %138 = tpu.matmul %136, %137, %cst_54 {dimension_numbers = #tpu.dot_dimension_numbers<[1], [0], [0], [1], [0, 0, 1, 1], [], []>} : vector<8x128xbf16>, vector<128x128xbf16>, vector<8x128xf32> -> vector<8x128xf32>
    %c0_55 = arith.constant 0 : index
    %c0_56 = arith.constant 0 : index
    %139 = vector.load %arg10[%c0_55, %c0_56] : memref<1x128xf32, #tpu.memory_space<vmem>>, vector<1x128xf32>
    %140 = vector.broadcast %139 : vector<1x128xf32> to vector<8x128xf32>
    %141 = arith.addf %138, %140 : vector<8x128xf32>
    %cst_57 = arith.constant dense<0.000000e+00> : vector<8xf32>
    %142 = vector.multi_reduction <add>, %141, %cst_57 [1] : vector<8x128xf32> to vector<8xf32>
    %143 = vector.shape_cast %142 : vector<8xf32> to vector<8x1xf32>
    %cst_58 = arith.constant 6.400000e+01 : f32
    %144 = vector.broadcast %cst_58 : f32 to vector<8x1xf32>
    %145 = arith.divf %143, %144 : vector<8x1xf32>
    %146 = vector.broadcast %145 : vector<8x1xf32> to vector<8x128xf32>
    %147 = arith.subf %141, %146 : vector<8x128xf32>
    %cst_59 = arith.constant 0.000000e+00 : f32
    %148 = vector.shape_cast %4 : vector<1x128xi1> to vector<1x128xi1>
    %149 = vector.broadcast %148 : vector<1x128xi1> to vector<8x128xi1>
    %150 = vector.broadcast %cst_59 : f32 to vector<8x128xf32>
    %151 = arith.select %149, %147, %150 : vector<8x128xi1>, vector<8x128xf32>
    %152 = arith.mulf %151, %151 : vector<8x128xf32>
    %cst_60 = arith.constant dense<0.000000e+00> : vector<8xf32>
    %153 = vector.multi_reduction <add>, %152, %cst_60 [1] : vector<8x128xf32> to vector<8xf32>
    %154 = vector.shape_cast %153 : vector<8xf32> to vector<8x1xf32>
    %cst_61 = arith.constant 6.400000e+01 : f32
    %155 = vector.broadcast %cst_61 : f32 to vector<8x1xf32>
    %156 = arith.divf %154, %155 : vector<8x1xf32>
    %cst_62 = arith.constant 9.99999974E-6 : f32
    %157 = vector.broadcast %cst_62 : f32 to vector<8x1xf32>
    %158 = arith.addf %156, %157 : vector<8x1xf32>
    %159 = math.rsqrt %158 : vector<8x1xf32>
    %160 = vector.broadcast %159 : vector<8x1xf32> to vector<8x128xf32>
    %161 = arith.mulf %151, %160 : vector<8x128xf32>
    %cst_63 = arith.constant 0.000000e+00 : f32
    %162 = vector.broadcast %cst_63 : f32 to vector<8x128xf32>
    %163 = arith.maximumf %161, %162 : vector<8x128xf32>
    %164 = arith.truncf %107 : vector<8x128xf32> to vector<8x128xbf16>
    %c0_64 = arith.constant 0 : index
    %c0_65 = arith.constant 0 : index
    %165 = vector.load %arg11[%c0_64, %c0_65] : memref<128x256xbf16, #tpu.memory_space<vmem>>, vector<128x256xbf16>
    %cst_66 = arith.constant dense<0.000000e+00> : vector<8x256xf32>
    %166 = tpu.matmul %164, %165, %cst_66 {dimension_numbers = #tpu.dot_dimension_numbers<[1], [0], [0], [1], [0, 0, 1, 1], [], []>} : vector<8x128xbf16>, vector<128x256xbf16>, vector<8x256xf32> -> vector<8x256xf32>
    %167 = vector.extract_strided_slice %166 {offsets = [0, 0], sizes = [8, 128], strides = [1, 1]} : vector<8x256xf32> to vector<8x128xf32>
    %168 = vector.extract_strided_slice %79 {offsets = [0, 0], sizes = [8, 128], strides = [1, 1]} : vector<8x512xf32> to vector<8x128xf32>
    %169 = arith.addf %167, %168 : vector<8x128xf32>
    %170 = vector.extract_strided_slice %166 {offsets = [0, 128], sizes = [8, 128], strides = [1, 1]} : vector<8x256xf32> to vector<8x128xf32>
    %171 = vector.extract_strided_slice %79 {offsets = [0, 128], sizes = [8, 128], strides = [1, 1]} : vector<8x512xf32> to vector<8x128xf32>
    %172 = arith.addf %170, %171 : vector<8x128xf32>
    %173 = math.exp %172 : vector<8x128xf32>
    %174 = arith.mulf %173, %1 : vector<8x128xf32>
    %175 = arith.addf %169, %174 : vector<8x128xf32>
    %176 = math.exp %175 : vector<8x128xf32>
    %177 = arith.truncf %135 : vector<8x128xf32> to vector<8x128xbf16>
    %c0_67 = arith.constant 0 : index
    %c0_68 = arith.constant 0 : index
    %178 = vector.load %arg12[%c0_67, %c0_68] : memref<128x128xbf16, #tpu.memory_space<vmem>>, vector<128x128xbf16>
    %cst_69 = arith.constant dense<0.000000e+00> : vector<8x128xf32>
    %179 = tpu.matmul %177, %178, %cst_69 {dimension_numbers = #tpu.dot_dimension_numbers<[1], [0], [0], [1], [0, 0, 1, 1], [], []>} : vector<8x128xbf16>, vector<128x128xbf16>, vector<8x128xf32> -> vector<8x128xf32>
    %180 = vector.extract_strided_slice %79 {offsets = [0, 256], sizes = [8, 128], strides = [1, 1]} : vector<8x512xf32> to vector<8x128xf32>
    %181 = arith.addf %179, %180 : vector<8x128xf32>
    %cst_70 = arith.constant 0.000000e+00 : f32
    %182 = vector.broadcast %cst_70 : f32 to vector<8x128xf32>
    %183 = arith.maximumf %181, %182 : vector<8x128xf32>
    %cst_71 = arith.constant 1.000000e+00 : f32
    %184 = vector.broadcast %cst_71 : f32 to vector<8x128xf32>
    %185 = arith.addf %183, %184 : vector<8x128xf32>
    %cst_72 = arith.constant 9.99999993E-9 : f32
    %186 = vector.broadcast %cst_72 : f32 to vector<8x128xf32>
    %187 = arith.addf %185, %186 : vector<8x128xf32>
    %188 = arith.mulf %176, %187 : vector<8x128xf32>
    %189 = arith.truncf %163 : vector<8x128xf32> to vector<8x128xbf16>
    %c0_73 = arith.constant 0 : index
    %c0_74 = arith.constant 0 : index
    %190 = vector.load %arg13[%c0_73, %c0_74] : memref<128x128xbf16, #tpu.memory_space<vmem>>, vector<128x128xbf16>
    %cst_75 = arith.constant dense<0.000000e+00> : vector<8x128xf32>
    %191 = tpu.matmul %189, %190, %cst_75 {dimension_numbers = #tpu.dot_dimension_numbers<[1], [0], [0], [1], [0, 0, 1, 1], [], []>} : vector<8x128xbf16>, vector<128x128xbf16>, vector<8x128xf32> -> vector<8x128xf32>
    %192 = vector.extract_strided_slice %79 {offsets = [0, 384], sizes = [8, 128], strides = [1, 1]} : vector<8x512xf32> to vector<8x128xf32>
    %193 = arith.addf %191, %192 : vector<8x128xf32>
    %194 = arith.negf %193 : vector<8x128xf32>
    %195 = math.exp %194 : vector<8x128xf32>
    %cst_76 = arith.constant 1.000000e+00 : f32
    %196 = vector.broadcast %cst_76 : f32 to vector<8x128xf32>
    %197 = arith.addf %196, %195 : vector<8x128xf32>
    %198 = arith.divf %196, %197 : vector<8x128xf32>
    %199 = tpu.iota {dimensions = array<i32: 1>} : vector<1x128xi32>
    %c40_i32 = arith.constant 40 : i32
    %200 = vector.broadcast %c40_i32 : i32 to vector<1x128xi32>
    %201 = arith.cmpi slt, %199, %200 : vector<1x128xi32>
    %cst_77 = arith.constant 1.000000e+00 : f32
    %202 = vector.broadcast %cst_77 : f32 to vector<8x128xf32>
    %203 = arith.subf %202, %198 : vector<8x128xf32>
    %204 = arith.mulf %203, %188 : vector<8x128xf32>
    %cst_78 = arith.constant 0.000000e+00 : f32
    %205 = vector.shape_cast %201 : vector<1x128xi1> to vector<1x128xi1>
    %206 = vector.broadcast %205 : vector<1x128xi1> to vector<8x128xi1>
    %207 = vector.broadcast %cst_78 : f32 to vector<8x128xf32>
    %208 = arith.select %206, %204, %207 : vector<8x128xi1>, vector<8x128xf32>
    %209 = math.absf %208 : vector<8x128xf32>
    %cst_79 = arith.constant dense<0.000000e+00> : vector<8xf32>
    %210 = vector.multi_reduction <add>, %209, %cst_79 [1] : vector<8x128xf32> to vector<8xf32>
    %211 = vector.shape_cast %210 : vector<8xf32> to vector<8x1xf32>
    %cst_80 = arith.constant 9.99999996E-13 : f32
    %212 = vector.broadcast %cst_80 : f32 to vector<8x1xf32>
    %213 = arith.maximumf %211, %212 : vector<8x1xf32>
    %214 = tpu.reciprocal %213 {approx = true} : vector<8x1xf32> -> vector<8x1xf32>
    %215 = vector.broadcast %214 : vector<8x1xf32> to vector<8x128xf32>
    %216 = arith.mulf %208, %215 : vector<8x128xf32>
    %c0_81 = arith.constant 0 : index
    %c0_82 = arith.constant 0 : index
    %217 = vector.load %arg14[%c0_81, %c0_82] : memref<8x640xf32, #tpu.memory_space<vmem>>, vector<8x128xf32>
    tpu.vector_store %arg14[%c0_81, %c0_82], %169 {strides = array<i32>} : memref<8x640xf32, #tpu.memory_space<vmem>>, vector<8x128xf32>,
    %c0_83 = arith.constant 0 : index
    %c128 = arith.constant 128 : index
    %218 = vector.load %arg14[%c0_83, %c128] : memref<8x640xf32, #tpu.memory_space<vmem>>, vector<8x128xf32>
    tpu.vector_store %arg14[%c0_83, %c128], %173 {strides = array<i32>} : memref<8x640xf32, #tpu.memory_space<vmem>>, vector<8x128xf32>,
    %c0_84 = arith.constant 0 : index
    %c256 = arith.constant 256 : index
    %219 = vector.load %arg14[%c0_84, %c256] : memref<8x640xf32, #tpu.memory_space<vmem>>, vector<8x128xf32>
    tpu.vector_store %arg14[%c0_84, %c256], %187 {strides = array<i32>} : memref<8x640xf32, #tpu.memory_space<vmem>>, vector<8x128xf32>,
    %c0_85 = arith.constant 0 : index
    %c384 = arith.constant 384 : index
    %220 = vector.load %arg14[%c0_85, %c384] : memref<8x640xf32, #tpu.memory_space<vmem>>, vector<8x128xf32>
    tpu.vector_store %arg14[%c0_85, %c384], %193 {strides = array<i32>} : memref<8x640xf32, #tpu.memory_space<vmem>>, vector<8x128xf32>,
    %c0_86 = arith.constant 0 : index
    %c512 = arith.constant 512 : index
    %221 = vector.load %arg14[%c0_86, %c512] : memref<8x640xf32, #tpu.memory_space<vmem>>, vector<8x128xf32>
    tpu.vector_store %arg14[%c0_86, %c512], %216 {strides = array<i32>} : memref<8x640xf32, #tpu.memory_space<vmem>>, vector<8x128xf32>,
    return
  }
  func.func @transform_0(%arg0: i32) -> (i32, i32) {
    %c0_i32 = arith.constant 0 : i32
    %c0_i32_0 = arith.constant 0 : i32
    return %arg0, %c0_i32 : i32, i32
  }
  func.func @transform_1(%arg0: i32) -> (i32, i32) {
    %c0_i32 = arith.constant 0 : i32
    %c0_i32_0 = arith.constant 0 : i32
    return %arg0, %c0_i32 : i32, i32
  }
  func.func @transform_2(%arg0: i32) -> (i32, i32) {
    %c0_i32 = arith.constant 0 : i32
    %c0_i32_0 = arith.constant 0 : i32
    %c0_i32_1 = arith.constant 0 : i32
    return %c0_i32, %c0_i32_0 : i32, i32
  }
  func.func @transform_3(%arg0: i32) -> (i32, i32) {
    %c0_i32 = arith.constant 0 : i32
    %c0_i32_0 = arith.constant 0 : i32
    %c0_i32_1 = arith.constant 0 : i32
    return %c0_i32, %c0_i32_0 : i32, i32
  }
  func.func @transform_4(%arg0: i32) -> (i32, i32) {
    %c0_i32 = arith.constant 0 : i32
    %c0_i32_0 = arith.constant 0 : i32
    %c0_i32_1 = arith.constant 0 : i32
    return %c0_i32, %c0_i32_0 : i32, i32
  }
  func.func @transform_5(%arg0: i32) -> (i32, i32) {
    %c0_i32 = arith.constant 0 : i32
    %c0_i32_0 = arith.constant 0 : i32
    %c0_i32_1 = arith.constant 0 : i32
    return %c0_i32, %c0_i32_0 : i32, i32
  }
  func.func @transform_6(%arg0: i32) -> (i32, i32) {
    %c0_i32 = arith.constant 0 : i32
    %c0_i32_0 = arith.constant 0 : i32
    %c0_i32_1 = arith.constant 0 : i32
    return %c0_i32, %c0_i32_0 : i32, i32
  }
  func.func @transform_7(%arg0: i32) -> (i32, i32) {
    %c0_i32 = arith.constant 0 : i32
    %c0_i32_0 = arith.constant 0 : i32
    %c0_i32_1 = arith.constant 0 : i32
    return %c0_i32, %c0_i32_0 : i32, i32
  }
  func.func @transform_8(%arg0: i32) -> (i32, i32) {
    %c0_i32 = arith.constant 0 : i32
    %c0_i32_0 = arith.constant 0 : i32
    %c0_i32_1 = arith.constant 0 : i32
    return %c0_i32, %c0_i32_0 : i32, i32
  }
  func.func @transform_9(%arg0: i32) -> (i32, i32) {
    %c0_i32 = arith.constant 0 : i32
    %c0_i32_0 = arith.constant 0 : i32
    %c0_i32_1 = arith.constant 0 : i32
    return %c0_i32, %c0_i32_0 : i32, i32
  }
  func.func @transform_10(%arg0: i32) -> (i32, i32) {
    %c0_i32 = arith.constant 0 : i32
    %c0_i32_0 = arith.constant 0 : i32
    %c0_i32_1 = arith.constant 0 : i32
    return %c0_i32, %c0_i32_0 : i32, i32
  }
  func.func @transform_11(%arg0: i32) -> (i32, i32) {
    %c0_i32 = arith.constant 0 : i32
    %c0_i32_0 = arith.constant 0 : i32
    %c0_i32_1 = arith.constant 0 : i32
    return %c0_i32, %c0_i32_0 : i32, i32
  }
  func.func @transform_12(%arg0: i32) -> (i32, i32) {
    %c0_i32 = arith.constant 0 : i32
    %c0_i32_0 = arith.constant 0 : i32
    %c0_i32_1 = arith.constant 0 : i32
    return %c0_i32, %c0_i32_0 : i32, i32
  }
  func.func @transform_13(%arg0: i32) -> (i32, i32) {
    %c0_i32 = arith.constant 0 : i32
    %c0_i32_0 = arith.constant 0 : i32
    return %arg0, %c0_i32 : i32, i32
  }
}

</mosaic_0001>

<bundles_post_ra>
// kernel: tpu_custom_call.1
= control target key start
LH: loop header
LB: loop body
LE: loop exit
PB: predicated region body
PF: predicated region fallthrough
CT: control target
= control target key end

     0   :  { %s3332_s0 = inlined_call_operand.hbm [shape: bf16[16,32], index: 0, kind: input, shape index: {}]   ;;  %s3333_s1 = inlined_call_operand.hbm [shape: f32[16,128], index: 1, kind: input, shape index: {}]   ;;  %s3334_s2 = inlined_call_operand.hbm [shape: bf16[32,896], index: 2, kind: input, shape index: {}]   ;;  %s3335_s3 = inlined_call_operand.vmem [shape: f32[1,896], index: 3, kind: input, shape index: {}]   ;;  %s3336_s4 = inlined_call_operand.hbm [shape: bf16[128,128], index: 4, kind: input, shape index: {}]   ;;  %s3337_s5 = inlined_call_operand.vmem [shape: f32[1,128], index: 5, kind: input, shape index: {}]   ;;  %s3338_s6 = inlined_call_operand.hbm [shape: bf16[128,128], index: 6, kind: input, shape index: {}]   ;;  %s3339_s7 = inlined_call_operand.vmem [shape: f32[1,128], index: 7, kind: input, shape index: {}]   ;;  %s3340_s8 = inlined_call_operand.hbm [shape: bf16[128,128], index: 8, kind: input, shape index: {}]   ;;  %s3341_s9 = inlined_call_operand.vmem [shape: f32[1,128], index: 9, kind: input, shape index: {}]   ;;  %s3342_s10 = inlined_call_operand.hbm [shape: bf16[128,256], index: 10, kind: input, shape index: {}]   ;;  %s3343_s11 = inlined_call_operand.hbm [shape: bf16[128,128], index: 11, kind: input, shape index: {}]   ;;  %s3344_s12 = inlined_call_operand.hbm [shape: bf16[128,128], index: 12, kind: input, shape index: {}]   ;;  %s3345_s13 = inlined_call_operand.hbm [shape: f32[16,640], index: 13, kind: output, shape index: {}]  }
   0x1   :  { %3352 = sst [smem:[#allocation25_spill]] %s3332_s0 }
   0x2   :  { %3353 = sst [smem:[#allocation26_spill]] %s3334_s2 }
   0x3   :  { %3354 = sst [smem:[#allocation27_spill]] %s3335_s3 }
   0x4   :  { %3355 = sst [smem:[#allocation28_spill]] %s3336_s4 }
   0x5   :  { %3356 = sst [smem:[#allocation29_spill]] %s3337_s5 }
   0x6   :  { %3357 = sst [smem:[#allocation30_spill]] %s3338_s6 }
   0x7   :  { %3358 = sst [smem:[#allocation31_spill]] %s3339_s7 }
   0x8   :  { %3359 = sst [smem:[#allocation32_spill]] %s3341_s9 }
   0x9   :  { %3360 = sst [smem:[#allocation33_spill]] %s3345_s13 }
   0xa   :  { %18 = vsyncpa [#allocation3], 0 }
   0xb   :  { %20 = vsyncpa [#allocation3 + $0x1], 0 }
   0xc   :  { %21 = vsyncpa [#allocation6], 0 }
   0xd   :  { %23 = vsyncpa [#allocation6 + $0x1], 0 }
   0xe   :  { %24 = vsyncpa [#allocation9], 0 }
   0xf   :  { %25 = vsyncpa [#allocation12], 0 }
  0x10   :  { %26 = vsyncpa [#allocation15], 0 }
  0x11   :  { %27 = vsyncpa [#allocation4], 0 }
  0x12   :  { %29 = vsyncpa [#allocation4 + $0x1], 0  ;;  %s2804_s25 = smov 0   ;;  %s2806_s26 = smov 0  }
  0x13   :  { %s2808_s27 = smov 0   ;;  %s2810_s28 = smov 0  }
  0x14 LB: > { %s2715_s29 = smov [#allocation7]   ;;  %s2825_s14 = sadd.s32 4294967295, %s2713_s28   ;;  %s2713_s28 = sphi %s2810_s28, %s3396_s28   ;;  %s2709_s27 = sphi %s2808_s27, %s3395_s27   ;;  %s2705_s26 = sphi %s2806_s26, %s3394_s26   ;;  %s2701_s25 = sphi %s2804_s25, %s3393_s25  }
  0x15   : > { %s361_s30 = sshll.u32 %s2715_s29, 4  ;;  %p1867_p0 = scmp.ge.s32.totalorder %s2713_s28, 1  ;;  %s2830_s30 = int_to_ptr.vmem [resolvable:$true] %s361_s30 }
  0x16   : > { %p3347_p1 = scmp.eq.s32.totalorder %s2825_s14, 0  ;;  %p349_p2 = scmp.lt.s32.totalorder %s2713_s28, 3 }
  0x17   : > { %s2716_s16 = smov [#allocation8]   ;;  %s2717_s19 = smov [#allocation11]  }
  0x18   : > { %p2832_p3 = pnand %p1867_p0, %p349_p2  ;;  %s377_s17 = sshll.u32 %s2716_s16, 4  ;;  %s2845_s17 = int_to_ptr.vmem [resolvable:$true] %s377_s17 }
  0x19   : > { %s2847_s20 = sshll.u32 %s2717_s19, 4  ;;  %s3363_s2 = sld [smem:[#allocation26_spill]]  ;;  %s410_s20 = int_to_ptr.vmem [resolvable:$true] %s2847_s20 }
  0x1a   : > { %s3361_s15 = scalar_select %p2832_p3, 1, 0 }
  0x1b   : > { %p2168_p5 = pneg %p2832_p3 }
  0x1d   : > { %p2841_p6 = pnand %p2168_p5, %p3347_p1 }
  0x1f   : > { %s2371_s23 = scalar_lea.hbm %s3363_s2, 1792  ;;  %p2857_p8 = pneg %p2841_p6 }
  0x20   : > { %p2372_p7 = scmp.ne.s32.totalorder %s3363_s2, %s2371_s23  ;;  %p2378_p11 = scmp.lt.u32.totalorder %s2371_s23, %s3363_s2 }
  0x22   : > { %p2374_p9 = pnand %p2857_p8, %p2372_p7 }
  0x24   : > { %p2375_p10 = pneg %p2374_p9 }
  0x26   : > { %p2380_p12 = pnand %p2378_p11, %p2375_p10 }
  0x28   : > { %2383 = shalt.err (!%p2380_p12)
}
  0x29   : > { %s2384_s21 = scalar_lea.vmem %s2830_s30, 1792  ;;  %p2392_p5 = scmp.lt.s32.totalorder %s2830_s30, %s2830_s30 }
  0x2a   : > { %p2385_p13 = scmp.ne.s32.totalorder %s2830_s30, %s2384_s21  ;;  %p2393_p4 = scmp.lt.s32.totalorder %s2384_s21, %s2384_s21 }
  0x2c   : > { %p2387_p0 = pnand %p2385_p13, %p2857_p8  ;;  %p2394_p7 = por %p2393_p4, %p2392_p5 }
  0x2e   : > { %p2388_p2 = pneg %p2387_p0 }
  0x30   : > { %p2395_p9 = pnand %p2394_p7, %p2388_p2 }
  0x32   : > { %2398 = shalt.err (!%p2395_p9)
}
  0x33   : > { %s2718_s22 = smov 448   ;;  %s2719_s13 = smov 28  }
  0x34   : > { %2171 = dma.hbm_to_vmem [thread:$0]  (!%p2841_p6), %s3363_s2, 1792, %s2830_s30, [#allocation6], %s2718_s22, %s2718_s22, %s2719_s13  }
  0x35   : > { %s3365_s4 = sld [smem:[#allocation28_spill]] }
  0x3b   : > { %s2399_s9 = scalar_lea.hbm %s3365_s4, 1024 }
  0x3c   : > { %p2400_p4 = scmp.ne.s32.totalorder %s3365_s4, %s2399_s9  ;;  %p2406_p12 = scmp.lt.u32.totalorder %s2399_s9, %s3365_s4 }
  0x3e   : > { %p2402_p10 = pnand %p2400_p4, %p2857_p8 }
  0x40   : > { %p2403_p11 = pneg %p2402_p10 }
  0x42   : > { %p2408_p13 = pnand %p2406_p12, %p2403_p11 }
  0x44   : > { %2411 = shalt.err (!%p2408_p13)
}
  0x45   : > { %s2412_s30 = scalar_lea.vmem %s2845_s17, 1024  ;;  %p2420_p7 = scmp.lt.s32.totalorder %s2845_s17, %s2845_s17 }
  0x46   : > { %p2413_p0 = scmp.ne.s32.totalorder %s2845_s17, %s2412_s30  ;;  %p2421_p9 = scmp.lt.s32.totalorder %s2412_s30, %s2412_s30 }
  0x48   : > { %p2415_p2 = pnand %p2413_p0, %p2857_p8  ;;  %p2422_p4 = por %p2421_p9, %p2420_p7 }
  0x4a   : > { %p2416_p5 = pneg %p2415_p2 }
  0x4c   : > { %p2423_p10 = pnand %p2422_p4, %p2416_p5 }
  0x4e   : > { %2426 = shalt.err (!%p2423_p10)
}
  0x4f   : > { %s3349_s5 = smov 64   ;;  %s2721_s3 = smov 4  }
  0x50   : > { %2174 = dma.hbm_to_vmem [thread:$0]  (!%p2841_p6), %s3365_s4, 1024, %s2845_s17, [#allocation9], %s3349_s5, %s3349_s5, %s2721_s3  }
  0x51   : > { %s2427_s23 = scalar_lea.hbm %s3340_s8, 1024 }
  0x52   : > { %p2428_p11 = scmp.ne.s32.totalorder %s3340_s8, %s2427_s23  ;;  %p2434_p0 = scmp.lt.u32.totalorder %s2427_s23, %s3340_s8 }
  0x54   : > { %p2430_p12 = pnand %p2428_p11, %p2857_p8 }
  0x56   : > { %p2431_p13 = pneg %p2430_p12 }
  0x58   : > { %p2436_p2 = pnand %p2434_p0, %p2431_p13 }
  0x5a   : > { %2439 = shalt.err (!%p2436_p2)
}
  0x5b   : > { %s2440_s30 = scalar_lea.vmem %s410_s20, 1024  ;;  %p2448_p4 = scmp.lt.s32.totalorder %s410_s20, %s410_s20 }
  0x5c   : > { %p2441_p5 = scmp.ne.s32.totalorder %s410_s20, %s2440_s30  ;;  %p2449_p10 = scmp.lt.s32.totalorder %s2440_s30, %s2440_s30 }
  0x5e   : > { %p2443_p7 = pnand %p2441_p5, %p2857_p8  ;;  %p2450_p1 = por %p2449_p10, %p2448_p4 }
  0x60   : > { %p2444_p9 = pneg %p2443_p7 }
  0x62   : > { %p2451_p3 = pnand %p2450_p1, %p2444_p9 }
  0x64   : > { %2454 = shalt.err (!%p2451_p3)
}
  0x65   : > { %2180 = dma.hbm_to_vmem [thread:$0]  (!%p2841_p6), %s3340_s8, 1024, %s410_s20, [#allocation12], %s3349_s5, %s3349_s5, %s2721_s3  }
  0x66   : > { %s2722_s9 = smov [#allocation14]   ;;  %s2723_s13 = smov [#allocation10]  }
  0x67   : > { %s438_s22 = sshll.u32 %s2722_s9, 4  ;;  %s393_s23 = sshll.u32 %s2723_s13, 4  ;;  %s439_s22 = int_to_ptr.vmem [resolvable:$true] %s438_s22  ;;  %s394_s23 = int_to_ptr.vmem [resolvable:$true] %s393_s23 }
  0x68   : > { %s2455_s19 = scalar_lea.hbm %s3343_s11, 1024 }
  0x69   : > { %p2456_p1 = scmp.ne.s32.totalorder %s3343_s11, %s2455_s19  ;;  %p2462_p12 = scmp.lt.u32.totalorder %s2455_s19, %s3343_s11 }
  0x6b   : > { %p2458_p3 = pnand %p2456_p1, %p2857_p8 }
  0x6d   : > { %p2459_p11 = pneg %p2458_p3 }
  0x6f   : > { %p2464_p13 = pnand %p2462_p12, %p2459_p11 }
  0x71   : > { %2467 = shalt.err (!%p2464_p13)
}
  0x72   : > { %s2468_s20 = scalar_lea.vmem %s439_s22, 1024  ;;  %p2476_p7 = scmp.lt.s32.totalorder %s439_s22, %s439_s22 }
  0x73   : > { %p2469_p0 = scmp.ne.s32.totalorder %s439_s22, %s2468_s20  ;;  %p2477_p9 = scmp.lt.s32.totalorder %s2468_s20, %s2468_s20 }
  0x75   : > { %p2471_p2 = pnand %p2469_p0, %p2857_p8  ;;  %p2478_p4 = por %p2477_p9, %p2476_p7 }
  0x77   : > { %p2472_p5 = pneg %p2471_p2 }
  0x79   : > { %p2479_p10 = pnand %p2478_p4, %p2472_p5 }
  0x7b   : > { %2482 = shalt.err (!%p2479_p10)
}
  0x7c   : > { %2186 = dma.hbm_to_vmem [thread:$0]  (!%p2841_p6), %s3343_s11, 1024, %s439_s22, [#allocation15], %s3349_s5, %s3349_s5, %s2721_s3  }
  0x7d   : > { %s3366_s6 = sld [smem:[#allocation30_spill]] }
  0x83   : > { %s2483_s24 = scalar_lea.hbm %s3366_s6, 1024 }
  0x84   : > { %p2484_p1 = scmp.ne.s32.totalorder %s3366_s6, %s2483_s24  ;;  %p2490_p12 = scmp.lt.u32.totalorder %s2483_s24, %s3366_s6 }
  0x86   : > { %p2486_p3 = pnand %p2484_p1, %p2857_p8 }
  0x88   : > { %p2487_p11 = pneg %p2486_p3 }
  0x8a   : > { %p2492_p13 = pnand %p2490_p12, %p2487_p11 }
  0x8c   : > { %2495 = shalt.err (!%p2492_p13)
}
  0x8d   : > { %s2496_s17 = scalar_lea.vmem %s394_s23, 1024  ;;  %p2504_p7 = scmp.lt.s32.totalorder %s394_s23, %s394_s23 }
  0x8e   : > { %p2497_p0 = scmp.ne.s32.totalorder %s394_s23, %s2496_s17  ;;  %p2505_p9 = scmp.lt.s32.totalorder %s2496_s17, %s2496_s17 }
  0x90   : > { %p2499_p2 = pnand %p2497_p0, %p2857_p8  ;;  %p2506_p4 = por %p2505_p9, %p2504_p7 }
  0x92   : > { %p2500_p5 = pneg %p2499_p2 }
  0x94   : > { %p2507_p10 = pnand %p2506_p4, %p2500_p5 }
  0x96   : > { %2510 = shalt.err (!%p2507_p10)
}
  0x97   : > { %2177 = dma.hbm_to_vmem [thread:$0]  (!%p2841_p6), %s3366_s6, 1024, %s394_s23, [#allocation9], %s3349_s5, %s3349_s5, %s2721_s3  }
  0x98   : > { %s2724_s2 = smov [#allocation13]   ;;  %s2511_s24 = scalar_lea.hbm %s3342_s10, 2048 }
  0x99   : > { %s425_s7 = sshll.u32 %s2724_s2, 4  ;;  %p2512_p1 = scmp.ne.s32.totalorder %s3342_s10, %s2511_s24  ;;  %s426_s7 = int_to_ptr.vmem [resolvable:$true] %s425_s7 }
  0x9a   : > { %p2518_p12 = scmp.lt.u32.totalorder %s2511_s24, %s3342_s10 }
  0x9b   : > { %p2514_p3 = pnand %p2512_p1, %p2857_p8 }
  0x9d   : > { %p2515_p11 = pneg %p2514_p3 }
  0x9f   : > { %p2520_p13 = pnand %p2518_p12, %p2515_p11 }
  0xa1   : > { %2523 = shalt.err (!%p2520_p13)
}
  0xa2   : > { %s2524_s23 = scalar_lea.vmem %s426_s7, 2048  ;;  %p2532_p7 = scmp.lt.s32.totalorder %s426_s7, %s426_s7 }
  0xa3   : > { %p2525_p0 = scmp.ne.s32.totalorder %s426_s7, %s2524_s23  ;;  %p2533_p9 = scmp.lt.s32.totalorder %s2524_s23, %s2524_s23 }
  0xa5   : > { %p2527_p2 = pnand %p2525_p0, %p2857_p8  ;;  %p2534_p4 = por %p2533_p9, %p2532_p7 }
  0xa7   : > { %p2528_p5 = pneg %p2527_p2 }
  0xa9   : > { %p2535_p10 = pnand %p2534_p4, %p2528_p5 }
  0xab   : > { %2538 = shalt.err (!%p2535_p10)
}
  0xac   : > { %s2725_s17 = smov 128   ;;  %s2726_s22 = smov 8  }
  0xad   : > { %2183 = dma.hbm_to_vmem [thread:$0]  (!%p2841_p6), %s3342_s10, 2048, %s426_s7, [#allocation12], %s2725_s17, %s2725_s17, %s2726_s22  }
  0xae   : > { %s2727_s9 = smov [#allocation16]   ;;  %s2539_s19 = scalar_lea.hbm %s3344_s12, 1024 }
  0xaf   : > { %s451_s13 = sshll.u32 %s2727_s9, 4  ;;  %p2540_p1 = scmp.ne.s32.totalorder %s3344_s12, %s2539_s19  ;;  %s452_s13 = int_to_ptr.vmem [resolvable:$true] %s451_s13 }
  0xb0   : > { %p2546_p12 = scmp.lt.u32.totalorder %s2539_s19, %s3344_s12 }
  0xb1   : > { %p2542_p3 = pnand %p2540_p1, %p2857_p8 }
  0xb3   : > { %p2543_p11 = pneg %p2542_p3 }
  0xb5   : > { %p2548_p13 = pnand %p2546_p12, %p2543_p11 }
  0xb7   : > { %2551 = shalt.err (!%p2548_p13)
}
  0xb8   : > { %s2552_s7 = scalar_lea.vmem %s452_s13, 1024  ;;  %p2560_p7 = scmp.lt.s32.totalorder %s452_s13, %s452_s13 }
  0xb9   : > { %p2553_p0 = scmp.ne.s32.totalorder %s452_s13, %s2552_s7  ;;  %p2561_p9 = scmp.lt.s32.totalorder %s2552_s7, %s2552_s7 }
  0xbb   : > { %p2555_p2 = pnand %p2553_p0, %p2857_p8  ;;  %p2562_p4 = por %p2561_p9, %p2560_p7 }
  0xbd   : > { %p2556_p5 = pneg %p2555_p2 }
  0xbf   : > { %p2563_p10 = pnand %p2562_p4, %p2556_p5 }
  0xc1   : > { %2566 = shalt.err (!%p2563_p10)
}
  0xc2   : > { %s3367_s17 = smov 64   ;;  %s1866_s18 = sadd.s32 4294967294, %s2713_s28  }
  0xc3   : > { %2189 = dma.hbm_to_vmem [thread:$0]  (!%p2841_p6), %s3344_s12, 1024, %s452_s13, [#allocation15], %s3367_s17, %s3367_s17, %s2721_s3  }
  0xc4   : > { %s3009_s16 = sadd.s32 1, %s2713_s28   ;;  %s42_s20 = sadd.s32 1, %s2709_s27 }
  0xc5   : > { %s39_s2 = ssub.s32 %s2713_s28, %s3009_s16  ;;  %p49_p8 = scmp.ne.s32.totalorder %s2709_s27, %s2705_s26 }
  0xc6   : > { %p40_p1 = scmp.eq.s32.totalorder %s39_s2, 0  ;;  %p50_p3 = scmp.eq.s32.totalorder %s2713_s28, 0 }
  0xc7   : > { %p55_p11 = scmp.ne.s32.totalorder %s2705_s26, %s2701_s25  ;;  %p336_p12 = scmp.eq.s32.totalorder %s2825_s14, 1 }
  0xc8   : > { %s3021_s9 = scalar_select %p40_p1, %s2709_s27, %s42_s20  }
  0xc9   : > { %p51_p13 = por %p50_p3, %p49_p8  ;;  %p3368_p0 = scmp.eq.s32.totalorder %s2825_s14, 0 }
  0xca   : > { %p3029_p6 = por %p336_p12, %p49_p8  ;;  %p342_p5 = scmp.eq.s32.totalorder %s1866_s18, 1 }
  0xcb   : > { %p3025_p2 = por %p3368_p0, %p55_p11  ;;  %p2208_p7 = scmp.lt.s32.totalorder %s2713_s28, 2 }
  0xcc   : > { %s3370_s13 = scalar_select %p3029_p6, 1, 0 }
  0xcd   : > { %s3369_s3 = scalar_select %p3025_p2, 1, 0 }
  0xce   : > { %s3035_s24 = sand.u32 1, %s2709_s27   ;;  %p3037_p9 = por %p342_p5, %p55_p11 }
  0xcf   : > { %s1876_s19 = sshll.u32 %s3035_s24, 2  ;;  %s1877_s21 = sshll.u32 %s2713_s28, 6 }
  0xd0   : > { %s3371_s29 = scalar_select %p3037_p9, 1, 0 }
  0xd1   : > { %s3372_s0 = sld [smem:[#allocation25_spill]]  ;;  %s469_s17 = scalar_lea.vmem [#allocation2], %s1876_s19 }
  0xd2   : > { %s476_s5 = sshll.u32 %s469_s17, 4  ;;  %p3048_p4 = pnand %p2208_p7, %p51_p13  ;;  %s3052_s5 = int_to_ptr.vmem [resolvable:$true] %s476_s5 }
  0xd3   : > { %s466_s20 = scalar_lea.sflag [#allocation3], %s3035_s24 }
  0xd4   : > { %p2569_p8 = pneg %p3048_p4 }
  0xd7   : > { %s3046_s7 = scalar_lea.hbm %s3372_s0, %s1877_s21  ;;  %s2572_s30 = scalar_lea.hbm %s3372_s0, 128 }
  0xd8   : > { %s2567_s2 = scalar_lea.hbm %s3046_s7, 64  ;;  %p2573_p11 = scmp.lt.u32.totalorder %s3046_s7, %s3372_s0 }
  0xd9   : > { %p2568_p10 = scmp.ne.s32.totalorder %s3046_s7, %s2567_s2  ;;  %p2574_p12 = scmp.lt.u32.totalorder %s2572_s30, %s2567_s2 }
  0xda   : > { %p2576_p0 = scmp.lt.u32.totalorder %s2567_s2, %s3046_s7 }
  0xdb   : > { %p2570_p1 = pnand %p2569_p8, %p2568_p10  ;;  %p2575_p13 = por %p2574_p12, %p2573_p11 }
  0xdd   : > { %p2571_p3 = pneg %p2570_p1  ;;  %p2577_p5 = por %p2576_p0, %p2575_p13 }
  0xdf   : > { %p2578_p7 = pnand %p2577_p5, %p2571_p3 }
  0xe1   : > { %2581 = shalt.err (!%p2578_p7)
}
  0xe2   : > { %s2582_s18 = scalar_lea.vmem %s3052_s5, 64  ;;  %s2728_s19 = smov [#allocation2]  }
  0xe3   : > { %p2583_p10 = scmp.ne.s32.totalorder %s3052_s5, %s2582_s18  ;;  %s2587_s21 = sshll.u32 %s2728_s19, 4  ;;  %s2588_s21 = int_to_ptr.vmem [resolvable:$false] %s2587_s21 }
  0xe4   : > { %s2589_s23 = scalar_lea.vmem %s2588_s21, 128  ;;  %p2590_p6 = scmp.lt.s32.totalorder %s3052_s5, %s2588_s21 }
  0xe5   : > { %p2585_p1 = pnand %p2583_p10, %p2569_p8  ;;  %p2591_p11 = scmp.lt.s32.totalorder %s2589_s23, %s2582_s18 }
  0xe7   : > { %p2586_p9 = pneg %p2585_p1  ;;  %p2592_p12 = por %p2591_p11, %p2590_p6 }
  0xe9   : > { %p2593_p13 = pnand %p2592_p12, %p2586_p9 }
  0xeb   : > { %2596 = shalt.err (!%p2593_p13)
}
  0xec   : > { %2193 = dma.hbm_to_vmem [thread:$0]  (!%p3048_p4), %s3046_s7, 64, %s3052_s5, %s466_s20  }
  0xed   : > { %s1878_s2 = sshll.u32 %s3035_s24, 3  ;;  %s1879_s30 = sshll.u32 %s2713_s28, 7 }
  0xee   : > { %s3086_s0 = scalar_lea.hbm %s3333_s1, %s1879_s30  ;;  %s487_s18 = scalar_lea.vmem [#allocation5], %s1878_s2 }
  0xef   : > { %s494_s21 = sshll.u32 %s487_s18, 4  ;;  %s3374_s23 = sand.u32 1, %s2713_s28   ;;  %s495_s21 = int_to_ptr.vmem [resolvable:$true] %s494_s21 }
  0xf0   : > { %s484_s4 = scalar_lea.sflag [#allocation6], %s3374_s23  ;;  %s2597_s6 = scalar_lea.hbm %s3086_s0, 128 }
  0xf1   : > { %p2598_p6 = scmp.ne.s32.totalorder %s3086_s0, %s2597_s6  ;;  %s2602_s5 = scalar_lea.hbm %s3333_s1, 256 }
  0xf2   : > { %p2603_p0 = scmp.lt.u32.totalorder %s3086_s0, %s3333_s1  ;;  %p2604_p5 = scmp.lt.u32.totalorder %s2602_s5, %s2597_s6 }
  0xf3   : > { %p2600_p9 = pnand %p2598_p6, %p2569_p8  ;;  %p2606_p10 = scmp.lt.u32.totalorder %s2597_s6, %s3086_s0 }
  0xf4   : > { %p2605_p7 = por %p2604_p5, %p2603_p0 }
  0xf5   : > { %p2601_p3 = pneg %p2600_p9 }
  0xf6   : > { %p2607_p1 = por %p2606_p10, %p2605_p7 }
  0xf8   : > { %p2608_p11 = pnand %p2607_p1, %p2601_p3 }
  0xfa   : > { %2611 = shalt.err (!%p2608_p11)
}
  0xfb   : > { %s2612_s2 = scalar_lea.vmem %s495_s21, 128  ;;  %s2729_s17 = smov [#allocation5]  }
  0xfc   : > { %p2613_p12 = scmp.ne.s32.totalorder %s495_s21, %s2612_s2  ;;  %s2617_s19 = sshll.u32 %s2729_s17, 4  ;;  %s2618_s19 = int_to_ptr.vmem [resolvable:$false] %s2617_s19 }
  0xfd   : > { %s2619_s18 = scalar_lea.vmem %s2618_s19, 256  ;;  %p2620_p9 = scmp.lt.s32.totalorder %s495_s21, %s2618_s19 }
  0xfe   : > { %p2615_p13 = pnand %p2613_p12, %p2569_p8  ;;  %p2621_p2 = scmp.lt.s32.totalorder %s2619_s18, %s2612_s2 }
 0x100   : > { %p2616_p6 = pneg %p2615_p13  ;;  %p2622_p0 = por %p2621_p2, %p2620_p9 }
 0x102   : > { %p2623_p5 = pnand %p2622_p0, %p2616_p6 }
 0x104   : > { %2626 = shalt.err (!%p2623_p5)
}
 0x105   : > { %2196 = dma.hbm_to_vmem [thread:$0]  (!%p3048_p4), %s3086_s0, 128, %s495_s21, %s484_s4  }
 0x106   : > { %p3375_p3 = scmp.ne.s32.totalorder %s3361_s15, 0 }
 0x107   : > { %s3112_s6 = sand.u32 (!%p3375_p3), 1, %s2705_s26   ;;  %p3376_p8 = scmp.ne.s32.totalorder (!%p3375_p3), %s3369_s3, 0 }
 0x108   : > { %503 = sbr.rel (%p3375_p3) target bundleno = 1799 (0x707), region = 72  ;;  %s1881_s23 = sshll.u32 (!%p3375_p3), %s3112_s6, 2 }
 0x109   : > { %s506_s24 = scalar_lea.sflag (!%p3375_p3), [#allocation3], %s3112_s6  ;;  %s509_s7 = scalar_lea.vmem (!%p3375_p3), [#allocation2], %s1881_s23 }
 0x10f   : > { %2672 = dma.done.wait (%p3376_p8), %s506_s24, 64  }
 0x110   : > { %2674 = vsyncadd (%p3376_p8), %s506_s24, 4294967232  ;;  %s514_s0 = sand.u32 1, %s2825_s14   ;;  %s1882_s4 = sshll.u32 %s3112_s6, 3 }
 0x111   : > { %s515_s15 = scalar_lea.sflag [#allocation6], %s514_s0  ;;  %s3122_s22 = scalar_lea.vmem [#allocation5], %s1882_s4 }
 0x112   : > { %2676 = dma.done.wait (%p3376_p8), %s515_s15, 128  }
 0x113   : > { %2678 = vsyncadd (%p3376_p8), %s515_s15, 4294967168  ;;  %p3377_p2 = scmp.eq.s32.totalorder %s2825_s14, 0 }
 0x115   : > { %2680 = dma.done.wait (%p3377_p2), [#allocation6], 1792   ;;  %p3378_p4 = pmov %p3377_p2 }
 0x116   : > { %p3379_p7 = pmov %p3377_p2 }
 0x117   : > { %2682 = vsyncadd (%p3378_p4), [#allocation6], 4294965504 }
 0x118   : > { %2684 = dma.done.wait (%p3379_p7), [#allocation9], 2048   ;;  %p3380_p10 = pmov %p3377_p2 }
 0x119   : > { %p3381_p1 = pmov %p3377_p2 }
 0x11a   : > { %2686 = vsyncadd (%p3380_p10), [#allocation9], 4294965248 }
 0x11b   : > { %2688 = dma.done.wait (%p3381_p1), [#allocation12], 3072   ;;  %p3382_p11 = pmov %p3381_p1 }
 0x11c   : > { %p3383_p12 = pmov %p3381_p1 }
 0x11d   : > { %2690 = vsyncadd (%p3382_p11), [#allocation12], 4294964224 }
 0x11e   : > { %2692 = dma.done.wait (%p3383_p12), [#allocation15], 2048   ;;  %p3384_p13 = pmov %p3381_p1 }
 0x11f   : > { %v2730_v0 = vmov 0   ;;  %v2265_v1 = vld [vmem:[#allocation7 + $0x4] ss:$28 sps:$4 sm:$0xff]   ;;  %v2268_v3 = vld [vmem:[#allocation7 + $0x3c] ss:$28 sps:$4 sm:$0xff]   ;;  %vm725_vm0 = vcmask 261120   ;;  %v597_v10 = vlaneseq }
 0x120   : > { %2694 = vsyncadd (%p3384_p13), [#allocation15], 4294965248  ;;  %761 = vmatprep.mubr.bf16.mxu0 %v2730_v0  ;;  %802 = vmatprep.mubr.bf16.mxu1 %v2730_v0  ;;  %v2267_v2 = vld [vmem:[#allocation7] ss:$28 sps:$4 sm:$0xff]   ;;  %v2270_v4 = vld [vmem:[#allocation7 + $0xc] ss:$28 sps:$4 sm:$0xff]  }
 0x121   : > { %729 = vmatprep.subr.bf16.mxu0 %v2265_v1  ;;  %v2272_v5 = vld [vmem:[#allocation7 + $0x38] ss:$28 sps:$4 sm:$0xff]   ;;  %v2273_v6 = vld [vmem:[#allocation7 + $0x8] ss:$28 sps:$4 sm:$0xff]   ;;  %770 = vmatprep.subr.bf16.mxu1 %v2270_v4  ;;  %v2276_v9 = vld [vmem:[#allocation7 + $0x40] ss:$28 sps:$4 sm:$0xff]  }
 0x122   : > { %730 = vmatpush1.bf16.msra.mxu0 %v2267_v2  ;;  %v595_v7 = vld [vmem:[%s509_s7] sm:$0xf]  ;;  %v2274_v8 = vld [vmem:[#allocation7 + $0x44] ss:$28 sps:$4 sm:$0xff]   ;;  %771 = vmatpush1.bf16.msra.mxu1 %v2273_v6  ;;  %v3149_v11 = vshrl.u32 %v597_v10, 7  ;;  %s3385_s5 = sld [smem:[#allocation27_spill]] }
 0x123   : > { %731 = vmatprep.subr.bf16.mxu0 %v2268_v3  ;;  %772 = vmatprep.subr.bf16.mxu1 %v2274_v8  ;;  %v2277_v30 = vld [vmem:[#allocation7 + $0x10] ss:$28 sps:$4 sm:$0xff]   ;;  %v2283_v33 = vld [vmem:[#allocation7 + $0x18] ss:$28 sps:$4 sm:$0xff]   ;;  %v2731_v34 = vmov 0.0   ;;  %vm2732_vm1 = vmmov 0  }
 0x124   : > { %v620_v12 = vsub.s32 0, %v3149_v11  ;;  %v624_v14 = vsub.s32 1, %v3149_v11  ;;  %v628_v15 = vsub.s32 2, %v3149_v11  ;;  %v2279_v31 = vld [vmem:[#allocation7 + $0x14] ss:$28 sps:$4 sm:$0xff]   ;;  %v2286_v39 = vld [vmem:[#allocation8 + $0x8] sm:$0xff]  }
 0x125   : > { %v2282_v32 = vld [vmem:[#allocation7 + $0x4c] ss:$28 sps:$4 sm:$0xff]   ;;  %v2284_v37 = vld [vmem:[#allocation8] sm:$0xff]   ;;  %v2289_v40 = vld [vmem:[#allocation10 + $0x8] sm:$0xff]   ;;  %v3184_v42 = vand.u32 127, %v597_v10  ;;  %s3386_s2 = sld [smem:[#allocation29_spill]] }
 0x126   : > { %732 = vmatpush1.bf16.msra.mxu0 %v2272_v5  ;;  %773 = vmatpush1.bf16.msra.mxu1 %v2276_v9  ;;  %v2280_v35 = vld [vmem:[#allocation7 + $0x48] ss:$28 sps:$4 sm:$0xff]   ;;  %v2285_v36 = vld [vmem:[#allocation7 + $0x50] ss:$28 sps:$4 sm:$0xff]   ;;  %v2294_v62 = vld [vmem:[#allocation8 + $0x28] sm:$0xff]   ;;  %s3387_s18 = sld [smem:[#allocation31_spill]] }
 0x127   : > { %811 = vmatprep.subr.bf16.mxu0 %v2279_v31  ;;  %2019 = vmatprep.subr.bf16.mxu1 %v2731_v34  ;;  %v2287_v38 = vld [vmem:[#allocation10] sm:$0xff]   ;;  %v2288_v41 = vld [vmem:[#allocation8 + $0x10] sm:$0xff]   ;;  %vm599_vm2 = vcmp.lt.s32.totalorder %v3184_v42, 64  ;;  %v2290_v58 = vld [vmem:[#allocation8 + $0x18] sm:$0xff]   ;;  %s3388_s7 = sld [smem:[#allocation32_spill]]  ;;  %s2132_s0 = smul.u32 40, %s3112_s6 }
 0x128   : > { %v3155_v13 = vld [vmem:[%s3385_s5] sm:$0xff]  ;;  %v2291_v59 = vld [vmem:[#allocation10 + $0x10] sm:$0xff]   ;;  %v2292_v60 = vld [vmem:[#allocation8 + $0x20] sm:$0xff]   ;;  %vm1675_vm3 = vcmp.lt.s32.totalorder %v3184_v42, 40  ;;  %s2133_s15 = smul.u32 640, %s2825_s14  ;;  %s3389_s5 = sld [smem:[#allocation33_spill]] }
 0x129   : > { %1904 = vmatmul.mubr.msk.bf16.vlgmr.msra.gmra.mrb[0].mxu0 %vm725_vm0, %v595_v7  ;;  %1905 = vmatmul.mubr.msk.bf16.vlgmr.msra.gmra.mrb[0].mxu1 %vm725_vm0, %v595_v7  ;;  %v621_v16 = vrot.slane %v3155_v13, %v620_v12  ;;  %v625_v17 = vrot.slane %v3155_v13, %v624_v14  ;;  %v629_v19 = vrot.slane %v3155_v13, %v628_v15  ;;  %v2293_v61 = vld [vmem:[#allocation10 + $0x18] sm:$0xff]   ;;  %v2295_v63 = vld [vmem:[#allocation10 + $0x20] sm:$0xff]   ;;  %v2296_v1 = vld [vmem:[#allocation8 + $0x30] sm:$0xff]   ;;  %s3272_s4 = scalar_lea.vmem [#allocation17], %s2132_s0  ;;  %s1693_s30 = scalar_lea.sflag [#allocation4], %s3112_s6 }
 0x12a   : > { %843 = vmatprep.mubr.bf16.mxu0 %v2730_v0  ;;  %812 = vmatpush1.bf16.msra.mxu0 %v2277_v30  ;;  %v2297_v2 = vld [vmem:[#allocation10 + $0x28] sm:$0xff]   ;;  %v2298_v3 = vld [vmem:[#allocation8 + $0x38] sm:$0xff]   ;;  %v2299_v4 = vld [vmem:[#allocation10 + $0x30] sm:$0xff]   ;;  %p3390_p9 = scmp.ne.s32.totalorder %s3370_s13, 0  ;;  %s2733_s14 = smov [#allocation17]  }
 0x12b   : > { %2020 = vmatpush3.bf16.msra.mxu1 %v2283_v33  ;;  %813 = vmatprep.subr.bf16.mxu0 %v2282_v32  ;;  %v2301_v5 = vld [vmem:[#allocation10 + $0x38] sm:$0xff]   ;;  %v2303_v32 = vld [vmem:[#allocation11 + $0x10] sm:$0xff]   ;;  %s2631_s17 = sshll.u32 %s2733_s14, 4  ;;  %s2632_s17 = int_to_ptr.vmem [resolvable:$false] %s2631_s17 }
 0x12c   : > { %2021 = vmatprep.subr.bf16.mxu1 %v2731_v34  ;;  %2023 = vmatprep.mubr.msk.bf16.mxu1 %vm2732_vm1, %v2731_v34  ;;  %v2304_v33 = vld [vmem:[#allocation11 + $0x18] sm:$0xff]   ;;  %s2633_s19 = scalar_lea.vmem %s2632_s17, 1280 }
 0x12e   : > { %814 = vmatpush1.bf16.msra.mxu0 %v2280_v35  ;;  %v2305_v35 = vld [vmem:[#allocation11 + $0x20] sm:$0xff]   ;;  %s3287_s20 = scalar_lea.hbm %s3389_s5, %s2133_s15 }
 0x12f   : > { %2022 = vmatpush3.bf16.msra.mxu1 %v2285_v36  ;;  %2027 = vmatprep.subr.bf16.mxu0 %v2731_v34  ;;  %v2306_v36 = vld [vmem:[#allocation11 + $0x28] sm:$0xff]  }
 0x130   : > { %2047 = vmatprep.subr.bf16.mxu1 %v2731_v34 }
 0x131   : > { %1906 = vmatmul.mubr.msk.bf16.vlgmr.msra.gmra.mrb[4].mxu0 %vm725_vm0, %v595_v7 }
 0x132   : > { %2024 = vmatmul.mubr.msk.bf16.vlgmr.msra.gmra.mrb[4].mxu1 %vm725_vm0, %v595_v7  ;;  %2028 = vmatpush3.bf16.msra.mxu0 %v2284_v37 }
 0x133   : > { %2048 = vmatpush3.bf16.msra.mxu1 %v2287_v38  ;;  %2029 = vmatprep.subr.bf16.mxu0 %v2731_v34  ;;  %v2307_v38 = vld [vmem:[#allocation11 + $0x30] sm:$0xff]  }
 0x134   : > { %2049 = vmatprep.subr.bf16.mxu1 %v2731_v34  ;;  %2043 = vmatprep.mubr.msk.bf16.mxu0 %vm2732_vm1, %v2731_v34 }
 0x135   : > { %2063 = vmatprep.mubr.msk.bf16.mxu1 %vm2732_vm1, %v2731_v34 }
 0x136   : > { %2030 = vmatpush3.bf16.msra.mxu0 %v2286_v39  ;;  %v2308_v39 = vld [vmem:[#allocation11 + $0x38] sm:$0xff]  }
 0x137   : > { %2050 = vmatpush3.bf16.msra.mxu1 %v2289_v40  ;;  %2031 = vmatprep.subr.bf16.mxu0 %v2731_v34 }
 0x138   : > { %2051 = vmatprep.subr.bf16.mxu1 %v2731_v34 }
 0x13a   : > { %2032 = vmatpush3.bf16.msra.mxu0 %v2288_v41 }
 0x13b   : > { %2033 = vmatprep.subr.bf16.mxu0 %v2731_v34  ;;  %2052 = vmatpush3.bf16.msra.mxu1 %v2291_v59 }
 0x13c   : > { %2053 = vmatprep.subr.bf16.mxu1 %v2731_v34 }
 0x13e   : > { %2034 = vmatpush3.bf16.msra.mxu0 %v2290_v58 }
 0x13f   : > { %2035 = vmatprep.subr.bf16.mxu0 %v2731_v34  ;;  %2054 = vmatpush3.bf16.msra.mxu1 %v2293_v61  ;;  %v2309_v61 = vld [vmem:[#allocation13] ss:$8 sps:$4 sm:$0xff]  }
 0x140   : > { %2055 = vmatprep.subr.bf16.mxu1 %v2731_v34 }
 0x142   : > { %2036 = vmatpush3.bf16.msra.mxu0 %v2292_v60 }
 0x143   : > { %2037 = vmatprep.subr.bf16.mxu0 %v2731_v34  ;;  %2056 = vmatpush3.bf16.msra.mxu1 %v2295_v63  ;;  %v2314_v63 = vld [vmem:[#allocation13 + $0x14] ss:$8 sps:$4 sm:$0xff]  }
 0x144   : > { %2057 = vmatprep.subr.bf16.mxu1 %v2731_v34 }
 0x146   : > { %2038 = vmatpush3.bf16.msra.mxu0 %v2294_v62  ;;  %v2311_v62 = vld [vmem:[#allocation13 + $0x4] ss:$8 sps:$4 sm:$0xff]  }
 0x147   : > { %2039 = vmatprep.subr.bf16.mxu0 %v2731_v34  ;;  %2058 = vmatpush3.bf16.msra.mxu1 %v2297_v2  ;;  %v2312_v2 = vld [vmem:[#allocation13 + $0x10] ss:$8 sps:$4 sm:$0xff]  }
 0x148   : > { %2059 = vmatprep.subr.bf16.mxu1 %v2731_v34 }
 0x14a   : > { %2040 = vmatpush3.bf16.msra.mxu0 %v2296_v1  ;;  %v2315_v1 = vld [vmem:[#allocation14] sm:$0xff]  }
 0x14b   : > { %2041 = vmatprep.subr.bf16.mxu0 %v2731_v34  ;;  %2060 = vmatpush3.bf16.msra.mxu1 %v2299_v4  ;;  %v2318_v4 = vld [vmem:[#allocation13 + $0x24] ss:$8 sps:$4 sm:$0xff]  }
 0x14c   : > { %2061 = vmatprep.subr.bf16.mxu1 %v2731_v34 }
 0x14e   : > { %2042 = vmatpush3.bf16.msra.mxu0 %v2298_v3  ;;  %v2319_v3 = vld [vmem:[#allocation14 + $0x8] sm:$0xff]  }
 0x14f   : > { %2067 = vmatprep.subr.bf16.mxu0 %v2731_v34  ;;  %2062 = vmatpush3.bf16.msra.mxu1 %v2301_v5  ;;  %v2316_v5 = vld [vmem:[#allocation13 + $0x20] ss:$8 sps:$4 sm:$0xff]  }
 0x150   : > { %1406 = vmatprep.subr.bf16.mxu1 %v2311_v62 }
 0x1fc   : > { %v763_v18 = vpop.f32.mrb[0].mxu0  ;;  %v804_v25 = vpop.f32.mrb[0].mxu1 }
 0x1fd   : > { %v764_v20 = vadd.f32 %v763_v18, %v621_v16  ;;  %v765_v21 = vpop.f32.mrb[1].mxu0  ;;  %v805_v26 = vadd.f32 %v804_v25, %v629_v19  ;;  %v3165_v27 = vpop.f32.mrb[1].mxu1 }
 0x1fe   : > { %v3162_v22 = vadd.f32 %v765_v21, %v625_v17  ;;  %v767_v23 = vpop.f32.mrb[2].mxu0  ;;  %v808_v28 = vpop.f32.mrb[2].mxu1 }
 0x1ff   : > { %v768_v24 = vpop.f32.mrb[3].mxu0  ;;  %892 = vadd.xlane.f32.xlu0 %v764_v20  ;;  %v809_v29 = vpop.f32.mrb[3].mxu1 }
 0x200   : > { %908 = vadd.xlane.f32.xlu1 %v3162_v22  ;;  %v2302_v29 = vld [vmem:[#allocation11 + $0x8] sm:$0xff]  }
 0x203   : > { %921 = vadd.xlane.f32.xlu0 %v805_v26 }
 0x204   : > { %v3208_v6 = vpop.f32.mrb[4].mxu0 }
 0x205   : > { %v3210_v7 = vpop.f32.mrb[5].mxu0 }
 0x206   : > { %v849_v8 = vpop.f32.mrb[6].mxu0 }
 0x207   : > { %v850_v9 = vpop.f32.mrb[7].mxu0 }
 0x28c   : > { %v893_v43 = vpop.xlane.xlu0 %892 }
 0x28d   : > { %v895_v44 = vmul.f32 0.015625, %v893_v43  ;;  %v909_v45 = vpop.xlane.xlu1 %908  ;;  %v1908_v43 = vld [vmem:[%s3386_s2] ss:$0 sm:$0xff] }
 0x28e   : > { %v910_v46 = vmul.f32 0.015625, %v909_v45 }
 0x28f   : > { %v896_v47 = vsub.f32 %v764_v20, %v895_v44 }
 0x290   : > { %v911_v48 = vsub.f32 %v3162_v22, %v910_v46  ;;  %v922_v49 = vpop.xlane.xlu0 %921  ;;  %v2300_v22 = vld [vmem:[#allocation11] sm:$0xff]  }
 0x291   : > { %v923_v50 = vmul.f32 0.015625, %v922_v49  ;;  %v899_v51 = vsel %vm599_vm2, %v896_v47, 0.0 }
 0x292   : > { %v900_v52 = vmul.f32 %v899_v51, %v899_v51  ;;  %v912_v54 = vsel %vm599_vm2, %v911_v48, 0.0  ;;  %v1917_v48 = vld [vmem:[%s3387_s18] ss:$0 sm:$0xff] }
 0x293   : > { %v924_v53 = vsub.f32 %v805_v26, %v923_v50  ;;  %v913_v56 = vmul.f32 %v912_v54, %v912_v54 }
 0x294   : > { %901 = vadd.xlane.f32.xlu1 %v900_v52 }
 0x295   : > { %v3194_v55 = vsel %vm599_vm2, %v924_v53, 0.0 }
 0x296   : > { %v926_v57 = vmul.f32 %v3194_v55, %v3194_v55 }
 0x298   : > { %914 = vadd.xlane.f32.xlu1 %v913_v56  ;;  %927 = vadd.xlane.f32.xlu0 %v926_v57 }
 0x321   : > { %v902_v10 = vpop.xlane.xlu1 %901 }
 0x322   : > { %v903_v12 = vmul.f32 0.015625, %v902_v10 }
 0x324   : > { %v904_v14 = vadd.f32 1e-05, %v903_v12 }
 0x325   : > { %v915_v15 = vpop.xlane.xlu1 %914  ;;  %v928_v23 = vpop.xlane.xlu0 %927 }
 0x326   : > { %2349 = vrsqrt.f32 %v904_v14  ;;  %v916_v16 = vmul.f32 0.015625, %v915_v15  ;;  %v929_v28 = vmul.f32 0.015625, %v928_v23  ;;  %v2326_v23 = vld [vmem:[#allocation13 + $0x44] ss:$8 sps:$4 sm:$0xff]  }
 0x328   : > { %v917_v17 = vadd.f32 1e-05, %v916_v16  ;;  %v930_v31 = vadd.f32 1e-05, %v929_v28  ;;  %v2328_v28 = vld [vmem:[#allocation13 + $0x50] ss:$8 sps:$4 sm:$0xff]  }
 0x32a   : > { %2351 = vrsqrt.f32 %v917_v17 }
 0x32b   : > { %2353 = vrsqrt.f32 %v930_v31 }
 0x330   : > { %v2350_v18 = vpop.eup %2349 }
 0x331   : > { %v906_v19 = vmul.f32 %v2350_v18, %v899_v51 }
 0x333   : > { %v907_v20 = vmax.f32 %v906_v19, 0.0 }
 0x334   : > { %v2352_v21 = vpop.eup %2351 }
 0x335   : > { %v934_v24 = vpack.c.bf16 %v907_v20, %v907_v20  ;;  %v919_v25 = vmul.f32 %v2352_v21, %v912_v54  ;;  %v2354_v37 = vpop.eup %2353  ;;  %v2322_v20 = vld [vmem:[#allocation13 + $0x34] ss:$8 sps:$4 sm:$0xff]   ;;  %v2320_v21 = vld [vmem:[#allocation13 + $0x30] ss:$8 sps:$4 sm:$0xff]  }
 0x337   : > { %2044 = vmatmul.mubr.bf16.vlgmr.msra.gmra.mrb[8].mxu0 %v934_v24  ;;  %v920_v26 = vmax.f32 %v919_v25, 0.0  ;;  %v2324_v24 = vld [vmem:[#allocation13 + $0x40] ss:$8 sps:$4 sm:$0xff]   ;;  %v2327_v25 = vld [vmem:[#allocation14 + $0x18] sm:$0xff]  }
 0x338   : > { %2068 = vmatpush3.bf16.msra.mxu0 %v2300_v22  ;;  %2083 = vmatprep.mubr.msk.bf16.mxu0 %vm2732_vm1, %v2731_v34  ;;  %v2323_v22 = vld [vmem:[#allocation14 + $0x10] sm:$0xff]  }
 0x339   : > { %2069 = vmatprep.subr.bf16.mxu0 %v2731_v34  ;;  %v1059_v30 = vpack.c.bf16 %v920_v26, %v920_v26  ;;  %v2330_v26 = vld [vmem:[#allocation13 + $0x54] ss:$8 sps:$4 sm:$0xff]  }
 0x33b   : > { %2064 = vmatmul.mubr.bf16.vlgmr.msra.gmra.mrb[8].mxu1 %v1059_v30  ;;  %v2334_v30 = vld [vmem:[#allocation13 + $0x64] ss:$8 sps:$4 sm:$0xff]  }
 0x33c   : > { %2070 = vmatpush3.bf16.msra.mxu0 %v2302_v29  ;;  %1438 = vmatprep.mubr.bf16.mxu1 %v2730_v0  ;;  %v932_v0 = vmul.f32 %v2354_v37, %v3194_v55  ;;  %v1926_v55 = vld [vmem:[%s3388_s7] ss:$0 sm:$0xff]  ;;  %v2331_v29 = vld [vmem:[#allocation14 + $0x20] sm:$0xff]  }
 0x33d   : > { %2071 = vmatprep.subr.bf16.mxu0 %v2731_v34  ;;  %1407 = vmatpush1.bf16.msra.mxu1 %v2309_v61 }
 0x33e   : > { %v933_v40 = vmax.f32 %v932_v0, 0.0  ;;  %1408 = vmatprep.subr.bf16.mxu1 %v2314_v63 }
 0x340   : > { %2072 = vmatpush3.bf16.msra.mxu0 %v2303_v32  ;;  %v1184_v41 = vpack.c.bf16 %v933_v40, %v933_v40  ;;  %v2332_v32 = vld [vmem:[#allocation13 + $0x60] ss:$8 sps:$4 sm:$0xff]  }
 0x341   : > { %2073 = vmatprep.subr.bf16.mxu0 %v2731_v34  ;;  %1409 = vmatpush1.bf16.msra.mxu1 %v2312_v2  ;;  %v2346_v2 = vld [vmem:[#allocation16 + $0x28] sm:$0xff]  }
 0x342   : > { %1410 = vmatprep.subr.bf16.mxu1 %v2318_v4 }
 0x344   : > { %2074 = vmatpush3.bf16.msra.mxu0 %v2304_v33 }
 0x345   : > { %2075 = vmatprep.subr.bf16.mxu0 %v2731_v34  ;;  %1411 = vmatpush1.bf16.msra.mxu1 %v2316_v5  ;;  %v2348_v5 = vld [vmem:[#allocation16 + $0x38] sm:$0xff]  }
 0x346   : > { %1412 = vmatprep.subr.bf16.mxu1 %v2322_v20 }
 0x348   : > { %2076 = vmatpush3.bf16.msra.mxu0 %v2305_v35  ;;  %v2335_v35 = vld [vmem:[#allocation14 + $0x28] sm:$0xff]  }
 0x349   : > { %2077 = vmatprep.subr.bf16.mxu0 %v2731_v34  ;;  %1413 = vmatpush1.bf16.msra.mxu1 %v2320_v21 }
 0x34a   : > { %1414 = vmatprep.subr.bf16.mxu1 %v2326_v23 }
 0x34c   : > { %2078 = vmatpush3.bf16.msra.mxu0 %v2306_v36  ;;  %v2338_v36 = vld [vmem:[#allocation13 + $0x74] ss:$8 sps:$4 sm:$0xff]  }
 0x34d   : > { %2079 = vmatprep.subr.bf16.mxu0 %v2731_v34  ;;  %1415 = vmatpush1.bf16.msra.mxu1 %v2324_v24 }
 0x34e   : > { %1416 = vmatprep.subr.bf16.mxu1 %v2330_v26 }
 0x350   : > { %2080 = vmatpush3.bf16.msra.mxu0 %v2307_v38  ;;  %v2336_v38 = vld [vmem:[#allocation13 + $0x70] ss:$8 sps:$4 sm:$0xff]  }
 0x351   : > { %2081 = vmatprep.subr.bf16.mxu0 %v2731_v34  ;;  %1417 = vmatpush1.bf16.msra.mxu1 %v2328_v28 }
 0x352   : > { %1418 = vmatprep.subr.bf16.mxu1 %v2334_v30 }
 0x354   : > { %2082 = vmatpush3.bf16.msra.mxu0 %v2308_v39  ;;  %v2339_v39 = vld [vmem:[#allocation14 + $0x30] sm:$0xff]  }
 0x355   : > { %2087 = vmatprep.subr.bf16.mxu0 %v2731_v34  ;;  %1419 = vmatpush1.bf16.msra.mxu1 %v2332_v32 }
 0x356   : > { %1420 = vmatprep.subr.bf16.mxu1 %v2338_v36  ;;  %v596_v36 = vld [vmem:[%s3122_s22] sm:$0xff]  ;;  %s1707_s22 = sshll.u32 %s3272_s4, 4  ;;  %s3289_s22 = int_to_ptr.vmem [resolvable:$true] %s1707_s22 }
 0x357   : > { %2084 = vmatmul.mubr.bf16.vlgmr.msra.gmra.mrb[12].mxu0 %v1184_v41  ;;  %v2341_v41 = vld [vmem:[#allocation14 + $0x38] sm:$0xff]   ;;  %s2627_s2 = scalar_lea.vmem %s3289_s22, 640  ;;  %p2634_p3 = scmp.lt.s32.totalorder %s3289_s22, %s2632_s17 }
 0x358   : > { %2103 = vmatprep.mubr.msk.bf16.mxu0 %vm2732_vm1, %v2731_v34  ;;  %2088 = vmatpush3.bf16.msra.mxu0 %v2315_v1  ;;  %v2345_v1 = vld [vmem:[#allocation16 + $0x20] sm:$0xff]   ;;  %p2628_p6 = scmp.ne.s32.totalorder %s3289_s22, %s2627_s2  ;;  %p2635_p8 = scmp.lt.s32.totalorder %s2633_s19, %s2627_s2 }
 0x359   : > { %2089 = vmatprep.subr.bf16.mxu0 %v2731_v34  ;;  %1421 = vmatpush1.bf16.msra.mxu1 %v2336_v38 }
 0x35a   : > { %2107 = vmatprep.subr.bf16.mxu1 %v2731_v34  ;;  %p2629_p0 = pnand %p2628_p6, %p3390_p9  ;;  %p2636_p2 = por %p2635_p8, %p2634_p3 }
 0x35c   : > { %2090 = vmatpush3.bf16.msra.mxu0 %v2319_v3  ;;  %v2347_v3 = vld [vmem:[#allocation16 + $0x30] sm:$0xff]   ;;  %p2630_p5 = pneg %p2629_p0 }
 0x35d   : > { %2091 = vmatprep.subr.bf16.mxu0 %v2731_v34 }
 0x35e   : > { %p2637_p4 = pnand %p2636_p2, %p2630_p5 }
 0x360   : > { %2092 = vmatpush3.bf16.msra.mxu0 %v2323_v22 }
 0x361   : > { %2093 = vmatprep.subr.bf16.mxu0 %v2731_v34 }
 0x364   : > { %2094 = vmatpush3.bf16.msra.mxu0 %v2327_v25 }
 0x365   : > { %2095 = vmatprep.subr.bf16.mxu0 %v2731_v34 }
 0x368   : > { %2096 = vmatpush3.bf16.msra.mxu0 %v2331_v29 }
 0x369   : > { %2097 = vmatprep.subr.bf16.mxu0 %v2731_v34 }
 0x36c   : > { %2098 = vmatpush3.bf16.msra.mxu0 %v2335_v35 }
 0x36d   : > { %2099 = vmatprep.subr.bf16.mxu0 %v2731_v34 }
 0x370   : > { %2100 = vmatpush3.bf16.msra.mxu0 %v2339_v39  ;;  %v644_v39 = vsub.s32 6, %v3149_v11 }
 0x371   : > { %2101 = vmatprep.subr.bf16.mxu0 %v2731_v34 }
 0x374   : > { %2102 = vmatpush3.bf16.msra.mxu0 %v2341_v41 }
 0x40a   : > { %v1040_v44 = vpop.f32.mrb[8].mxu0 }
 0x40b   : > { %v1041_v45 = vadd.f32 %v1908_v43, %v1040_v44  ;;  %v2045_v46 = vpop.f32.mrb[9].mxu0 }
 0x40c   : > { %v1043_v47 = vpop.f32.mrb[10].mxu0 }
 0x40d   : > { %v2046_v49 = vpop.f32.mrb[11].mxu0  ;;  %1046 = vadd.xlane.f32.xlu0 %v1041_v45 }
 0x40e   : > { %v1165_v50 = vpop.f32.mrb[8].mxu1 }
 0x40f   : > { %v1166_v51 = vadd.f32 %v1917_v48, %v1165_v50  ;;  %v2065_v52 = vpop.f32.mrb[9].mxu1 }
 0x410   : > { %v1168_v53 = vpop.f32.mrb[10].mxu1 }
 0x411   : > { %v2066_v54 = vpop.f32.mrb[11].mxu1  ;;  %1171 = vadd.xlane.f32.xlu0 %v1166_v51  ;;  %v2340_v53 = vld [vmem:[#allocation16] sm:$0xff]  }
 0x42a   : > { %v1290_v56 = vpop.f32.mrb[12].mxu0 }
 0x42b   : > { %v3235_v57 = vadd.f32 %v1926_v55, %v1290_v56  ;;  %v2085_v58 = vpop.f32.mrb[13].mxu0 }
 0x42c   : > { %v1293_v59 = vpop.f32.mrb[14].mxu0 }
 0x42d   : > { %1296 = vadd.xlane.f32.xlu1 %v3235_v57  ;;  %v2086_v60 = vpop.f32.mrb[15].mxu0  ;;  %v2343_v59 = vld [vmem:[#allocation16 + $0x10] sm:$0xff]  }
 0x42e   : > { %v2344_v60 = vld [vmem:[#allocation16 + $0x18] sm:$0xff]  }
 0x49a   : > { %v1047_v8 = vpop.xlane.xlu0 %1046 }
 0x49b   : > { %v1048_v9 = vmul.f32 0.015625, %v1047_v8 }
 0x49d   : > { %v1049_v10 = vsub.f32 %v1041_v45, %v1048_v9 }
 0x49e   : > { %v1172_v12 = vpop.xlane.xlu0 %1171 }
 0x49f   : > { %v1173_v14 = vmul.f32 0.015625, %v1172_v12  ;;  %v1050_v15 = vsel %vm599_vm2, %v1049_v10, 0.0  ;;  %v632_v12 = vsub.s32 3, %v3149_v11 }
 0x4a0   : > { %v1051_v16 = vmul.f32 %v1050_v15, %v1050_v15 }
 0x4a1   : > { %v1174_v17 = vsub.f32 %v1166_v51, %v1173_v14  ;;  %v636_v14 = vsub.s32 4, %v3149_v11 }
 0x4a2   : > { %1052 = vadd.xlane.f32.xlu1 %v1051_v16  ;;  %v640_v16 = vsub.s32 5, %v3149_v11 }
 0x4a3   : > { %v1175_v18 = vsel %vm599_vm2, %v1174_v17, 0.0  ;;  %v637_v17 = vrot.slane %v3155_v13, %v636_v14 }
 0x4a4   : > { %v1176_v19 = vmul.f32 %v1175_v18, %v1175_v18 }
 0x4a6   : > { %1177 = vadd.xlane.f32.xlu1 %v1176_v19  ;;  %v846_v19 = vadd.f32 %v3208_v6, %v637_v17 }
 0x4ba   : > { %v1297_v31 = vpop.xlane.xlu1 %1296 }
 0x4bb   : > { %v1298_v33 = vmul.f32 0.015625, %v1297_v31 }
 0x4bd   : > { %v1299_v37 = vsub.f32 %v3235_v57, %v1298_v33  ;;  %v2342_v57 = vld [vmem:[#allocation16 + $0x8] sm:$0xff]  }
 0x4bf   : > { %v1300_v0 = vsel %vm599_vm2, %v1299_v37, 0.0 }
 0x4c0   : > { %v1301_v40 = vmul.f32 %v1300_v0, %v1300_v0 }
 0x4c2   : > { %1302 = vadd.xlane.f32.xlu0 %v1301_v40  ;;  %v645_v40 = vrot.slane %v3155_v13, %v644_v39 }
 0x52f   : > { %v1053_v43 = vpop.xlane.xlu1 %1052 }
 0x530   : > { %v1054_v44 = vmul.f32 0.015625, %v1053_v43 }
 0x532   : > { %v1055_v45 = vadd.f32 1e-05, %v1054_v44 }
 0x533   : > { %v1178_v46 = vpop.xlane.xlu1 %1177 }
 0x534   : > { %2355 = vrsqrt.f32 %v1055_v45  ;;  %v1179_v47 = vmul.f32 0.015625, %v1178_v46 }
 0x536   : > { %v1180_v48 = vadd.f32 1e-05, %v1179_v47 }
 0x538   : > { %2357 = vrsqrt.f32 %v1180_v48 }
 0x53e   : > { %v2356_v49 = vpop.eup %2355 }
 0x53f   : > { %v1057_v50 = vmul.f32 %v2356_v49, %v1050_v15  ;;  %v633_v15 = vrot.slane %v3155_v13, %v632_v12 }
 0x541   : > { %v1058_v51 = vmax.f32 %v1057_v50, 0.0 }
 0x542   : > { %v2358_v52 = vpop.eup %2357 }
 0x543   : > { %v1309_v54 = vpack.c.bf16 %v1058_v51, %v1058_v51  ;;  %v1182_v55 = vmul.f32 %v2358_v52, %v1175_v18  ;;  %v807_v18 = vadd.f32 %v3165_v27, %v633_v15 }
 0x545   : > { %1439 = vmatmul.mubr.bf16.vlgmr.msra.gmra.mrb[12].mxu1 %v1309_v54  ;;  %v1183_v56 = vmax.f32 %v1182_v55, 0.0 }
 0x546   : > { %2108 = vmatpush3.bf16.msra.mxu1 %v2340_v53  ;;  %2123 = vmatprep.mubr.msk.bf16.mxu1 %vm2732_vm1, %v2731_v34 }
 0x547   : > { %2109 = vmatprep.subr.bf16.mxu1 %v2731_v34  ;;  %v1455_v58 = vpack.c.bf16 %v1183_v56, %v1183_v56 }
 0x549   : > { %2104 = vmatmul.mubr.bf16.vlgmr.msra.gmra.mrb[16].mxu0 %v1455_v58 }
 0x54a   : > { %2110 = vmatpush3.bf16.msra.mxu1 %v2342_v57 }
 0x54b   : > { %2111 = vmatprep.subr.bf16.mxu1 %v2731_v34 }
 0x54e   : > { %2112 = vmatpush3.bf16.msra.mxu1 %v2343_v59 }
 0x54f   : > { %v1303_v61 = vpop.xlane.xlu0 %1302  ;;  %2113 = vmatprep.subr.bf16.mxu1 %v2731_v34 }
 0x550   : > { %v1304_v62 = vmul.f32 0.015625, %v1303_v61 }
 0x552   : > { %v1305_v63 = vadd.f32 1e-05, %v1304_v62  ;;  %2114 = vmatpush3.bf16.msra.mxu1 %v2344_v60 }
 0x553   : > { %2115 = vmatprep.subr.bf16.mxu1 %v2731_v34 }
 0x554   : > { %2359 = vrsqrt.f32 %v1305_v63 }
 0x556   : > { %2116 = vmatpush3.bf16.msra.mxu1 %v2345_v1 }
 0x557   : > { %2117 = vmatprep.subr.bf16.mxu1 %v2731_v34 }
 0x55a   : > { %2118 = vmatpush3.bf16.msra.mxu1 %v2346_v2 }
 0x55b   : > { %2119 = vmatprep.subr.bf16.mxu1 %v2731_v34 }
 0x55e   : > { %v2360_v4 = vpop.eup %2359  ;;  %2120 = vmatpush3.bf16.msra.mxu1 %v2347_v3 }
 0x55f   : > { %2121 = vmatprep.subr.bf16.mxu1 %v2731_v34  ;;  %v1307_v8 = vmul.f32 %v2360_v4, %v1300_v0  ;;  %v641_v34 = vrot.slane %v3155_v13, %v640_v16 }
 0x561   : > { %v1308_v9 = vmax.f32 %v1307_v8, 0.0  ;;  %v848_v25 = vadd.f32 %v3210_v7, %v641_v34 }
 0x562   : > { %2122 = vmatpush3.bf16.msra.mxu1 %v2348_v5 }
 0x563   : > { %v1564_v10 = vpack.c.bf16 %v1308_v9, %v1308_v9 }
 0x565   : > { %2124 = vmatmul.mubr.bf16.vlgmr.msra.gmra.mrb[4].mxu1 %v1564_v10 }
 0x618   : > { %v1440_v20 = vpop.f32.mrb[12].mxu1 }
 0x619   : > { %v1447_v21 = vadd.f32 %v1440_v20, %v807_v18  ;;  %v1442_v22 = vpop.f32.mrb[13].mxu1 }
 0x61a   : > { %v1448_v23 = vadd.f32 %v1442_v22, %v846_v19  ;;  %v1444_v24 = vpop.f32.mrb[14].mxu1 }
 0x61b   : > { %1687 = vst [vmem:[%s3272_s4] sm:$0xff] %v1447_v21  ;;  %v1445_v26 = vpop.f32.mrb[15].mxu1 }
 0x61c   : > { %v1449_v27 = vmul.f32 1.442695, %v1448_v23  ;;  %v1554_v28 = vpop.f32.mrb[16].mxu0 }
 0x61d   : > { %v1555_v29 = vadd.f32 %v1554_v28, %v848_v25  ;;  %v2105_v30 = vpop.f32.mrb[17].mxu0 }
 0x61e   : > { %2361 = vpow2.f32 %v1449_v27  ;;  %v1557_v6 = vpop.f32.mrb[18].mxu0 }
 0x61f   : > { %v1560_v31 = vmax.f32 %v1555_v29, 0.0  ;;  %v2106_v32 = vpop.f32.mrb[19].mxu0 }
 0x621   : > { %v1561_v33 = vadd.f32 1.0, %v1560_v31 }
 0x623   : > { %v1562_v35 = vadd.f32 1e-08, %v1561_v33 }
 0x625   : > { %1689 = vst [vmem:[%s3272_s4 + $0x10] sm:$0xff] %v1562_v35 }
 0x628   : > { %v2362_v7 = vpop.eup %2361 }
 0x629   : > { %v1451_v37 = vmul.f32 %v2362_v7, %v596_v36  ;;  %1688 = vst [vmem:[%s3272_s4 + $0x8] sm:$0xff] %v2362_v7 }
 0x62b   : > { %v1452_v38 = vadd.f32 %v1451_v37, %v1447_v21 }
 0x62d   : > { %v1453_v0 = vmul.f32 1.442695, %v1452_v38 }
 0x62f   : > { %2363 = vpow2.f32 %v1453_v0 }
 0x638   : > { %v1663_v41 = vpop.f32.mrb[4].mxu1 }
 0x639   : > { %v2364_v43 = vpop.eup %2363  ;;  %v2127_v44 = vadd.f32 %v1663_v41, %v645_v40  ;;  %v2125_v45 = vpop.f32.mrb[5].mxu1 }
 0x63a   : > { %v1563_v46 = vmul.f32 %v2364_v43, %v1562_v35  ;;  %v1666_v47 = vpop.f32.mrb[6].mxu1 }
 0x63b   : > { %v1967_v48 = vmul.f32 -1.442695, %v2127_v44  ;;  %1690 = vst [vmem:[%s3272_s4 + $0x18] sm:$0xff] %v2127_v44  ;;  %v2126_v49 = vpop.f32.mrb[7].mxu1 }
 0x63d   : > { %2365 = vpow2.f32 %v1967_v48 }
 0x647   : > { %v2366_v50 = vpop.eup %2365 }
 0x648   : > { %v1672_v51 = vadd.f32 1.0, %v2366_v50 }
 0x64a   : > { %2367 = vrcp.f32 %v1672_v51 }
 0x654   : > { %v2368_v52 = vpop.eup %2367 }
 0x655   : > { %v1676_v11 = vsub.f32 1.0, %v2368_v52 }
 0x657   : > { %v1677_v13 = vmul.f32 %v1676_v11, %v1563_v46 }
 0x659   : > { %v1680_v53 = vsel %vm1675_vm3, %v1677_v13, 0.0 }
 0x65a   : > { %v1681_v54 = vand.u32 2147483647, %v1680_v53 }
 0x65c   : > { %1682 = vadd.xlane.f32.xlu0 %v1681_v54 }
 0x6e9   : > { %v1683_v55 = vpop.xlane.xlu0 %1682 }
 0x6ea   : > { %v1684_v56 = vmax.f32 %v1683_v55, 1e-12 }
 0x6ec   : > { %2369 = vrcp.f32 %v1684_v56 }
 0x6f6   : > { %v2370_v57 = vpop.eup %2369 }
 0x6f7   : > { %v1686_v58 = vmul.f32 %v2370_v57, %v1680_v53 }
 0x6f9   : > { %1691 = vst [vmem:[%s3272_s4 + $0x20] sm:$0xff] %v1686_v58 }
 0x6fa   : > { %2640 = shalt.err (!%p2637_p4)
}
 0x6fb   : > { %s2641_s6 = scalar_lea.hbm %s3287_s20, 640  ;;  %s2645_s24 = scalar_lea.hbm %s3389_s5, 1280 }
 0x6fc   : > { %p2642_p7 = scmp.ne.s32.totalorder %s3287_s20, %s2641_s6  ;;  %p2646_p11 = scmp.lt.u32.totalorder %s3287_s20, %s3389_s5 }
 0x6fd   : > { %p2647_p12 = scmp.lt.u32.totalorder %s2645_s24, %s2641_s6  ;;  %p2649_p6 = scmp.lt.u32.totalorder %s2641_s6, %s3287_s20 }
 0x6fe   : > { %p2643_p10 = pnand %p2642_p7, %p3390_p9 }
 0x6ff   : > { %p2648_p13 = por %p2647_p12, %p2646_p11 }
 0x700   : > { %p2644_p1 = pneg %p2643_p10 }
 0x701   : > { %p2650_p0 = por %p2649_p6, %p2648_p13 }
 0x703   : > { %p2651_p5 = pnand %p2650_p0, %p2644_p1 }
 0x705   : > { %2654 = shalt.err (!%p2651_p5)
}
 0x706   : > { %2166 = dma.vmem_to_hbm [thread:$0]  (%p3390_p9), %s3289_s22, 640, %s3287_s20, %s1693_s30  }
 0x707 PF: > { %s1719_s4 = sand.u32 1, %s2701_s25   ;;  %p3391_p3 = scmp.ne.s32.totalorder %s3371_s29, 0 }
 0x708   : > { %p3392_p8 = scmp.ge.s32.totalorder %s2713_s28, 2  ;;  %s1720_s15 = scalar_lea.sflag [#allocation4], %s1719_s4 }
 0x70a   : > { %p2198_p2 = pnand %p3392_p8, %p3391_p3 }
 0x70c   : > { %2696 = dma.done.wait (!%p2198_p2), %s1720_s15, 640  }
 0x70d   : > { %2698 = vsyncadd (!%p2198_p2), %s1720_s15, 4294966656  ;;  %p32_p4 = scmp.ge.s32.totalorder %s3009_s16, 4   ;;  %s3393_s25 = smov %s2705_s26 }
 0x70e   : > { %s3394_s26 = smov %s2709_s27  ;;  %s3395_s27 = smov %s3021_s9 }
 0x70f   : > { %s3396_s28 = smov %s3009_s16  ;;  %34 = sbr.rel (!%p32_p4) target bundleno = 20 (0x14), region = 158 }
 0x716   :  { %1725 = vsyncpa [#allocation3], 1 }
 0x717   :  { %1727 = vsyncpa [#allocation3 + $0x1], 1 }
 0x718   :  { %1728 = vsyncpa [#allocation6], 1 }
 0x719   :  { %1730 = vsyncpa [#allocation6 + $0x1], 1 }
 0x71a   :  { %1731 = vsyncpa [#allocation9], 1 }
 0x71b   :  { %1732 = vsyncpa [#allocation12], 1 }
 0x71c   :  { %1733 = vsyncpa [#allocation15], 1 }
 0x71d   :  { %1734 = vsyncpa [#allocation4], 1 }
 0x71e   :  { %1736 = vsyncpa [#allocation4 + $0x1], 1 }

</bundles_post_ra>
